<compile_context>
chip_gen: v7x
topology: tpu7x:2x2x1
jax: 0.10.0
libtpu: 0.0.40
codegen_flags: <defaults>
</compile_context>

<pallas_src>
import jax
import jax.numpy as jnp
from jax.experimental import pallas as pl
from jax.experimental.pallas import tpu as pltpu

H1, H2, H3 = 512, 128, 64
H3_PAD = 128  # lane-dense padded fc3 width (unmasked vst, full MXU N)


def _cdiv(a, b):
    return -(-a // b)


def _round_up(x, m):
    return _cdiv(x, m) * m


# --------------------------------------------------------------- kernels ----

def _mlp_tail(h_f32, b1_ref, w2_ref, b2_ref, w3_ref, b3_ref, o_ref):
    """relu(fc1 acc) -> fc2+relu -> fc3; everything stays in VMEM/vregs."""
    cd = w2_ref.dtype
    h = jnp.maximum(h_f32 + b1_ref[...], 0.0)
    h = jnp.dot(h.astype(cd), w2_ref[...], preferred_element_type=jnp.float32)
    h = jnp.maximum(h + b2_ref[...], 0.0)
    h = jnp.dot(h.astype(cd), w3_ref[...], preferred_element_type=jnp.float32)
    o_ref[...] = (h + b3_ref[...]).astype(o_ref.dtype)


def encoder_kernel_fused(x_ref, w1_ref, b1_ref, w2_ref, b2_ref, w3_ref, b3_ref,
                         o_ref):
    # Single grid step over K: fc1 matmul straight into the tail.
    h = jnp.dot(x_ref[...], w1_ref[...], preferred_element_type=jnp.float32)
    _mlp_tail(h, b1_ref, w2_ref, b2_ref, w3_ref, b3_ref, o_ref)


def encoder_kernel_ksplit(x_ref, w1_ref, b1_ref, w2_ref, b2_ref, w3_ref, b3_ref,
                          o_ref, acc_ref):
    # fc1 reduced over a K grid axis; fc2/fc3 only on the last K step.
    k = pl.program_id(1)

    @pl.when(k == 0)
    def _():
        acc_ref[...] = jnp.zeros_like(acc_ref)

    acc_ref[...] += jnp.dot(x_ref[...], w1_ref[...],
                            preferred_element_type=jnp.float32)

    @pl.when(k == pl.num_programs(1) - 1)
    def _():
        _mlp_tail(acc_ref[...], b1_ref, w2_ref, b2_ref, w3_ref, b3_ref, o_ref)


# --------------------------------------------------------------- planning ----

def _plan_k(d_in, *, max_tk=2048):
    """fc1 K-split plan -> (n_k, tk, d_pad). tk is a multiple of 128 when split."""
    if d_in <= max_tk:
        return 1, d_in, d_in
    n_k = _cdiv(d_in, max_tk)
    tk = _round_up(_cdiv(d_in, n_k), 128)
    return n_k, tk, n_k * tk


def _vmem_estimate(tb, tk, n_k, act_bytes, single_buffer_weights):
    wbuf = 1 if single_buffer_weights else 2
    w1buf = 2 if n_k > 1 else wbuf          # W1 streams (double-buffers) when K-split
    x_b = 2 * tb * tk * act_bytes           # double-buffered x tile
    out_b = 2 * tb * H3_PAD * 4             # double-buffered output tile
    w1_b = w1buf * tk * H1 * act_bytes
    w_rest = wbuf * (H1 * H2 + H2 * H3_PAD) * act_bytes
    b_b = wbuf * (H1 + H2 + H3_PAD) * 4
    acc_b = tb * H1 * 4                     # fc1 accumulator / live f32 intermediate
    tmp_b = tb * H1 * act_bytes + tb * H3_PAD * 4  # casts + fc2/fc3 temps (rough)
    return x_b + out_b + w1_b + w_rest + b_b + acc_b + tmp_b


def _vmem_budget_bytes():
    try:
        phys = int(pltpu.get_tpu_info().vmem_capacity_bytes)
    except Exception:
        phys = 64 << 20  # conservative: v7x per-TensorCore VMEM
    return phys - (8 << 20)  # leave headroom for Mosaic internal scratch


# -------------------------------------------------------- one-time prepare ----

def prepare_params(params, *, use_bf16=True, max_tk=2048):
    """Pad/cast weights once (fc3 -> 128 lanes, fc1 K padding, bf16 weights)."""
    w1 = params["w1"]
    d_in = w1.shape[0]
    n_k, tk, d_pad = _plan_k(d_in, max_tk=max_tk)
    if d_pad != d_in:
        w1 = jnp.pad(w1, ((0, d_pad - d_in), (0, 0)))
    w3p = jnp.pad(params["w3"], ((0, 0), (0, H3_PAD - H3)))
    b3p = jnp.pad(params["b3"], ((0, 0), (0, H3_PAD - H3)))
    wd = jnp.bfloat16 if use_bf16 else jnp.float32
    prep = dict(
        w1=w1.astype(wd), b1=params["b1"].astype(jnp.float32),
        w2=params["w2"].astype(wd), b2=params["b2"].astype(jnp.float32),
        w3=w3p.astype(wd), b3=b3p.astype(jnp.float32),
    )
    meta = dict(d_in=d_in, d_pad=d_pad, tk=tk, n_k=n_k, use_bf16=use_bf16)
    return prep, meta


# --------------------------------------------------------------- pallas call ----

def _pallas_forward(args, *, B_pad, tb, d_pad, tk, n_k, n_b, act_bytes, budget,
                    single_buffer_weights):
    resident = {}
    if single_buffer_weights:
        resident = dict(pipeline_mode=pl.Buffered(1))

    if n_k == 1:
        grid = (n_b,)

        def const(shape):
            return pl.BlockSpec(shape, lambda i: (0,) * len(shape), **resident)

        in_specs = [
            pl.BlockSpec((tb, d_pad), lambda i: (i, 0)),        # x tile
            const((d_pad, H1)), const((1, H1)),                 # fc1
            const((H1, H2)), const((1, H2)),                    # fc2
            const((H2, H3_PAD)), const((1, H3_PAD)),            # fc3 (padded N)
        ]
        out_spec = pl.BlockSpec((tb, H3_PAD), lambda i: (i, 0))
        kernel, scratch = encoder_kernel_fused, []
        dims = ("parallel",)
    else:
        grid = (n_b, n_k)

        def const(shape):
            return pl.BlockSpec(shape, lambda i, k: (0,) * len(shape), **resident)

        in_specs = [
            pl.BlockSpec((tb, tk), lambda i, k: (i, k)),        # x K-tile
            pl.BlockSpec((tk, H1), lambda i, k: (k, 0)),        # W1 streams over K
            const((1, H1)),
            const((H1, H2)), const((1, H2)),
            const((H2, H3_PAD)), const((1, H3_PAD)),
        ]
        out_spec = pl.BlockSpec((tb, H3_PAD), lambda i, k: (i, 0))
        kernel = encoder_kernel_ksplit
        scratch = [pltpu.VMEM((tb, H1), jnp.float32)]
        dims = ("parallel", "arbitrary")

    vmem_est = _vmem_estimate(tb, tk, n_k, act_bytes, single_buffer_weights)
    cp_kwargs = dict(dimension_semantics=dims)
    if vmem_est > (14 << 20):  # v5e default scoped limit is 16 MiB
        cp_kwargs["vmem_limit_bytes"] = int(min(vmem_est + (8 << 20), budget))

    flops = 2 * B_pad * (d_pad * H1 + H1 * H2 + H2 * H3_PAD)
    bytes_accessed = (B_pad * d_pad * act_bytes
                      + (d_pad * H1 + H1 * H2 + H2 * H3_PAD) * act_bytes
                      + (H1 + H2 + H3_PAD) * 4
                      + B_pad * H3_PAD * 4)

    return pl.pallas_call(
        kernel,
        out_shape=jax.ShapeDtypeStruct((B_pad, H3_PAD), jnp.float32),
        grid_spec=pltpu.PrefetchScalarGridSpec(
            num_scalar_prefetch=0,
            grid=grid,
            in_specs=in_specs,
            out_specs=out_spec,
            scratch_shapes=scratch,
        ),
        compiler_params=pltpu.CompilerParams(**cp_kwargs),
        cost_estimate=pl.CostEstimate(flops=flops, transcendentals=0,
                                      bytes_accessed=bytes_accessed),
    )(*args)


def encoder_forward(x, prep, meta, *, max_tb=None):
    """x: (B, D_in) float32.  prep/meta: output of prepare_params."""
    B, d_in = x.shape
    assert d_in == meta["d_in"], (d_in, meta["d_in"])
    use_bf16 = meta["use_bf16"]
    d_pad, tk, n_k = meta["d_pad"], meta["tk"], meta["n_k"]
    act_dtype = jnp.bfloat16 if use_bf16 else jnp.float32
    act_bytes = 2 if use_bf16 else 4
    row_mult = 16 if use_bf16 else 8  # bf16 packs two rows per sublane

    budget = _vmem_budget_bytes()

    # Batch tile: big tiles when per-step MXU/DMA work is tiny, balanced last tile,
    # and at least 2 tiles for large batches so v7x's two TensorCores both run
    # (harmless 2-step serial loop on single-TC v5e/v6e).
    if max_tb is None:
        max_tb = 1024 if d_pad <= 1024 else (512 if d_pad <= 2048 else 256)
    B_r = _round_up(B, row_mult)
    n_b = max(_cdiv(B_r, max_tb), 2 if B_r >= 256 else 1)
    tb = _round_up(_cdiv(B_r, n_b), row_mult)
    while _vmem_estimate(tb, tk, n_k, act_bytes, True) > budget and tb > row_mult:
        tb = _round_up(_cdiv(tb, 2), row_mult)
    n_b = _cdiv(B_r, tb)
    tb = _round_up(_cdiv(B_r, n_b), row_mult)  # re-balance after any shrink
    B_pad = n_b * tb

    xp = x.astype(act_dtype) if use_bf16 else x
    if B_pad != B or d_pad != d_in:
        xp = jnp.pad(xp, ((0, B_pad - B), (0, d_pad - d_in)))

    args = (xp, prep["w1"], prep["b1"], prep["w2"], prep["b2"],
            prep["w3"], prep["b3"])

    def run(single_buffer_weights):
        return _pallas_forward(
            args, B_pad=B_pad, tb=tb, d_pad=d_pad, tk=tk, n_k=n_k, n_b=n_b,
            act_bytes=act_bytes, budget=budget,
            single_buffer_weights=single_buffer_weights)

    want_single = hasattr(pl, "Buffered")
    try:
        out_padded = run(want_single)
    except Exception:
        if not want_single:
            raise
        # Fallback if this JAX build rejects pipeline_mode=pl.Buffered(1).
        out_padded = run(False)

    return out_padded[:B, :H3]


# --------------------------------------------------------------- utilities ----

def init_params(key, input_size):
    """torch.nn.Linear-style init (uniform +/- 1/sqrt(fan_in)).

    Weights stored as (in_features, out_features) — transpose of torch's layout —
    so the kernel computes x @ W directly.
    """
    dims = [(input_size, H1), (H1, H2), (H2, H3)]
    params = {}
    for idx, (fan_in, fan_out) in enumerate(dims, start=1):
        key, kw, kb = jax.random.split(key, 3)
        bound = 1.0 / jnp.sqrt(jnp.float32(fan_in))
        params[f"w{idx}"] = jax.random.uniform(
            kw, (fan_in, fan_out), jnp.float32, minval=-bound, maxval=bound)
        params[f"b{idx}"] = jax.random.uniform(
            kb, (1, fan_out), jnp.float32, minval=-bound, maxval=bound)
    return params


def encoder_reference(x, p):
    h = jnp.maximum(x @ p["w1"] + p["b1"], 0.0)
    h = jnp.maximum(h @ p["w2"] + p["b2"], 0.0)
    return h @ p["w3"] + p["b3"]


if __name__ == "__main__":
    key = jax.random.PRNGKey(0)
    k_p, k_x, k_x2, k_x3, k_p2 = jax.random.split(key, 5)

    input_size = 256
    params = init_params(k_p, input_size)

    # 1) Default bf16 MXU path (loose tolerance — bf16 inputs, f32 accumulation).
    x = jax.random.normal(k_x, (8, input_size), jnp.float32)
    ref = encoder_reference(x, params)
    prep_bf16, meta_bf16 = prepare_params(params, use_bf16=True)
    out = jax.block_until_ready(encoder_forward(x, prep_bf16, meta_bf16))
    assert out.shape == (8, H3), out.shape
    assert jnp.allclose(out, ref, atol=5e-2, rtol=5e-2), "bf16 path mismatch"

    # 2) f32 path — exact check of the kernel math.
    prep_f32, meta_f32 = prepare_params(params, use_bf16=False)
    out_f32 = jax.block_until_ready(encoder_forward(x, prep_f32, meta_f32))
    assert jnp.allclose(out_f32, ref, atol=1e-4, rtol=1e-4), "f32 path mismatch"

    # 3) Batch not a multiple of the row tile — exercises balanced padding.
    x2 = jax.random.normal(k_x2, (20, input_size), jnp.float32)
    ref2 = encoder_reference(x2, params)
    out2 = jax.block_until_ready(encoder_forward(x2, prep_bf16, meta_bf16))
    assert out2.shape == (20, H3), out2.shape
    assert jnp.allclose(out2, ref2, atol=5e-2, rtol=5e-2), "padded-batch mismatch"

    # 4) fc1 K-split path, forced at a small size (max_tk=128 -> 3 K steps), f32 exact.
    input_size2 = 384
    params2 = init_params(k_p2, input_size2)
    x3 = jax.random.normal(k_x3, (24, input_size2), jnp.float32)
    ref3 = encoder_reference(x3, params2)
    prep_ks, meta_ks = prepare_params(params2, use_bf16=False, max_tk=128)
    assert meta_ks["n_k"] == 3, meta_ks
    out3 = jax.block_until_ready(encoder_forward(x3, prep_ks, meta_ks))
    assert out3.shape == (24, H3), out3.shape
    assert jnp.allclose(out3, ref3, atol=1e-4, rtol=1e-4), "K-split path mismatch"

    print("KERNEL_OK")
</pallas_src>

<mosaic_0001>
module attributes {stable_mosaic.version = 11 : i64} {
  func.func @encoder_kernel_fused(%arg0: i32, %arg1: memref<16x256xbf16, #tpu.memory_space<vmem>>, %arg2: memref<256x512xbf16, #tpu.memory_space<vmem>>, %arg3: memref<1x512xf32, #tpu.memory_space<vmem>>, %arg4: memref<512x128xbf16, #tpu.memory_space<vmem>>, %arg5: memref<1x128xf32, #tpu.memory_space<vmem>>, %arg6: memref<128x128xbf16, #tpu.memory_space<vmem>>, %arg7: memref<1x128xf32, #tpu.memory_space<vmem>>, %arg8: memref<16x128xf32, #tpu.memory_space<vmem>>) attributes {dimension_semantics = [#tpu.dimension_semantics<parallel>], iteration_bounds = array<i64: 1>, scalar_prefetch = 0 : i64, scratch_operands = 0 : i64, tpu.core_type = #tpu.core_type<tc>, window_params = [{transform_indices = @transform_0, window_bounds = array<i64: 16, 256>}, {pipeline_mode = #tpu.pipeline_mode<synchronous>, transform_indices = @transform_1, window_bounds = array<i64: 256, 512>}, {pipeline_mode = #tpu.pipeline_mode<synchronous>, transform_indices = @transform_2, window_bounds = array<i64: 1, 512>}, {pipeline_mode = #tpu.pipeline_mode<synchronous>, transform_indices = @transform_3, window_bounds = array<i64: 512, 128>}, {pipeline_mode = #tpu.pipeline_mode<synchronous>, transform_indices = @transform_4, window_bounds = array<i64: 1, 128>}, {pipeline_mode = #tpu.pipeline_mode<synchronous>, transform_indices = @transform_5, window_bounds = array<i64: 128, 128>}, {pipeline_mode = #tpu.pipeline_mode<synchronous>, transform_indices = @transform_6, window_bounds = array<i64: 1, 128>}, {transform_indices = @transform_7, window_bounds = array<i64: 16, 128>}]} {
    %c0 = arith.constant 0 : index
    %c0_0 = arith.constant 0 : index
    %0 = vector.load %arg1[%c0, %c0_0] : memref<16x256xbf16, #tpu.memory_space<vmem>>, vector<16x256xbf16>
    %c0_1 = arith.constant 0 : index
    %c0_2 = arith.constant 0 : index
    %1 = vector.load %arg2[%c0_1, %c0_2] : memref<256x512xbf16, #tpu.memory_space<vmem>>, vector<256x512xbf16>
    %cst = arith.constant dense<0.000000e+00> : vector<16x512xf32>
    %2 = tpu.matmul %0, %1, %cst {dimension_numbers = #tpu.dot_dimension_numbers<[1], [0], [0], [1], [0, 0, 1, 1], [], []>} : vector<16x256xbf16>, vector<256x512xbf16>, vector<16x512xf32> -> vector<16x512xf32>
    %c0_3 = arith.constant 0 : index
    %c0_4 = arith.constant 0 : index
    %3 = vector.load %arg3[%c0_3, %c0_4] : memref<1x512xf32, #tpu.memory_space<vmem>>, vector<1x512xf32>
    %4 = vector.broadcast %3 : vector<1x512xf32> to vector<16x512xf32>
    %5 = arith.addf %2, %4 : vector<16x512xf32>
    %cst_5 = arith.constant 0.000000e+00 : f32
    %6 = vector.broadcast %cst_5 : f32 to vector<16x512xf32>
    %7 = arith.maximumf %5, %6 : vector<16x512xf32>
    %8 = arith.truncf %7 : vector<16x512xf32> to vector<16x512xbf16>
    %c0_6 = arith.constant 0 : index
    %c0_7 = arith.constant 0 : index
    %9 = vector.load %arg4[%c0_6, %c0_7] : memref<512x128xbf16, #tpu.memory_space<vmem>>, vector<512x128xbf16>
    %cst_8 = arith.constant dense<0.000000e+00> : vector<16x128xf32>
    %10 = tpu.matmul %8, %9, %cst_8 {dimension_numbers = #tpu.dot_dimension_numbers<[1], [0], [0], [1], [0, 0, 1, 1], [], []>} : vector<16x512xbf16>, vector<512x128xbf16>, vector<16x128xf32> -> vector<16x128xf32>
    %c0_9 = arith.constant 0 : index
    %c0_10 = arith.constant 0 : index
    %11 = vector.load %arg5[%c0_9, %c0_10] : memref<1x128xf32, #tpu.memory_space<vmem>>, vector<1x128xf32>
    %12 = vector.broadcast %11 : vector<1x128xf32> to vector<16x128xf32>
    %13 = arith.addf %10, %12 : vector<16x128xf32>
    %cst_11 = arith.constant 0.000000e+00 : f32
    %14 = vector.broadcast %cst_11 : f32 to vector<16x128xf32>
    %15 = arith.maximumf %13, %14 : vector<16x128xf32>
    %16 = arith.truncf %15 : vector<16x128xf32> to vector<16x128xbf16>
    %c0_12 = arith.constant 0 : index
    %c0_13 = arith.constant 0 : index
    %17 = vector.load %arg6[%c0_12, %c0_13] : memref<128x128xbf16, #tpu.memory_space<vmem>>, vector<128x128xbf16>
    %cst_14 = arith.constant dense<0.000000e+00> : vector<16x128xf32>
    %18 = tpu.matmul %16, %17, %cst_14 {dimension_numbers = #tpu.dot_dimension_numbers<[1], [0], [0], [1], [0, 0, 1, 1], [], []>} : vector<16x128xbf16>, vector<128x128xbf16>, vector<16x128xf32> -> vector<16x128xf32>
    %c0_15 = arith.constant 0 : index
    %c0_16 = arith.constant 0 : index
    %19 = vector.load %arg7[%c0_15, %c0_16] : memref<1x128xf32, #tpu.memory_space<vmem>>, vector<1x128xf32>
    %20 = vector.broadcast %19 : vector<1x128xf32> to vector<16x128xf32>
    %21 = arith.addf %18, %20 : vector<16x128xf32>
    %c0_17 = arith.constant 0 : index
    %c0_18 = arith.constant 0 : index
    %22 = vector.load %arg8[%c0_17, %c0_18] : memref<16x128xf32, #tpu.memory_space<vmem>>, vector<16x128xf32>
    tpu.vector_store %arg8[%c0_17, %c0_18], %21 {strides = array<i32>} : memref<16x128xf32, #tpu.memory_space<vmem>>, vector<16x128xf32>,
    return
  }
  func.func @transform_0(%arg0: i32) -> (i32, i32) {
    %c0_i32 = arith.constant 0 : i32
    %c0_i32_0 = arith.constant 0 : i32
    return %arg0, %c0_i32 : i32, i32
  }
  func.func @transform_1(%arg0: i32) -> (i32, i32) {
    %c0_i32 = arith.constant 0 : i32
    %c0_i32_0 = arith.constant 0 : i32
    %c0_i32_1 = arith.constant 0 : i32
    return %c0_i32, %c0_i32_0 : i32, i32
  }
  func.func @transform_2(%arg0: i32) -> (i32, i32) {
    %c0_i32 = arith.constant 0 : i32
    %c0_i32_0 = arith.constant 0 : i32
    %c0_i32_1 = arith.constant 0 : i32
    return %c0_i32, %c0_i32_0 : i32, i32
  }
  func.func @transform_3(%arg0: i32) -> (i32, i32) {
    %c0_i32 = arith.constant 0 : i32
    %c0_i32_0 = arith.constant 0 : i32
    %c0_i32_1 = arith.constant 0 : i32
    return %c0_i32, %c0_i32_0 : i32, i32
  }
  func.func @transform_4(%arg0: i32) -> (i32, i32) {
    %c0_i32 = arith.constant 0 : i32
    %c0_i32_0 = arith.constant 0 : i32
    %c0_i32_1 = arith.constant 0 : i32
    return %c0_i32, %c0_i32_0 : i32, i32
  }
  func.func @transform_5(%arg0: i32) -> (i32, i32) {
    %c0_i32 = arith.constant 0 : i32
    %c0_i32_0 = arith.constant 0 : i32
    %c0_i32_1 = arith.constant 0 : i32
    return %c0_i32, %c0_i32_0 : i32, i32
  }
  func.func @transform_6(%arg0: i32) -> (i32, i32) {
    %c0_i32 = arith.constant 0 : i32
    %c0_i32_0 = arith.constant 0 : i32
    %c0_i32_1 = arith.constant 0 : i32
    return %c0_i32, %c0_i32_0 : i32, i32
  }
  func.func @transform_7(%arg0: i32) -> (i32, i32) {
    %c0_i32 = arith.constant 0 : i32
    %c0_i32_0 = arith.constant 0 : i32
    return %arg0, %c0_i32 : i32, i32
  }
}

module attributes {stable_mosaic.version = 11 : i64} {
  func.func @encoder_kernel_fused(%arg0: i32, %arg1: memref<16x256xbf16, #tpu.memory_space<vmem>>, %arg2: memref<256x512xbf16, #tpu.memory_space<vmem>>, %arg3: memref<1x512xf32, #tpu.memory_space<vmem>>, %arg4: memref<512x128xbf16, #tpu.memory_space<vmem>>, %arg5: memref<1x128xf32, #tpu.memory_space<vmem>>, %arg6: memref<128x128xbf16, #tpu.memory_space<vmem>>, %arg7: memref<1x128xf32, #tpu.memory_space<vmem>>, %arg8: memref<16x128xf32, #tpu.memory_space<vmem>>) attributes {dimension_semantics = [#tpu.dimension_semantics<parallel>], iteration_bounds = array<i64: 1>, scalar_prefetch = 0 : i64, scratch_operands = 0 : i64, tpu.core_type = #tpu.core_type<tc>, window_params = [{transform_indices = @transform_0, window_bounds = array<i64: 16, 256>}, {pipeline_mode = #tpu.pipeline_mode<synchronous>, transform_indices = @transform_1, window_bounds = array<i64: 256, 512>}, {pipeline_mode = #tpu.pipeline_mode<synchronous>, transform_indices = @transform_2, window_bounds = array<i64: 1, 512>}, {pipeline_mode = #tpu.pipeline_mode<synchronous>, transform_indices = @transform_3, window_bounds = array<i64: 512, 128>}, {pipeline_mode = #tpu.pipeline_mode<synchronous>, transform_indices = @transform_4, window_bounds = array<i64: 1, 128>}, {pipeline_mode = #tpu.pipeline_mode<synchronous>, transform_indices = @transform_5, window_bounds = array<i64: 128, 128>}, {pipeline_mode = #tpu.pipeline_mode<synchronous>, transform_indices = @transform_6, window_bounds = array<i64: 1, 128>}, {transform_indices = @transform_7, window_bounds = array<i64: 16, 128>}]} {
    %c0 = arith.constant 0 : index
    %c0_0 = arith.constant 0 : index
    %0 = vector.load %arg1[%c0, %c0_0] : memref<16x256xbf16, #tpu.memory_space<vmem>>, vector<16x256xbf16>
    %c0_1 = arith.constant 0 : index
    %c0_2 = arith.constant 0 : index
    %1 = vector.load %arg2[%c0_1, %c0_2] : memref<256x512xbf16, #tpu.memory_space<vmem>>, vector<256x512xbf16>
    %cst = arith.constant dense<0.000000e+00> : vector<16x512xf32>
    %2 = tpu.matmul %0, %1, %cst {dimension_numbers = #tpu.dot_dimension_numbers<[1], [0], [0], [1], [0, 0, 1, 1], [], []>} : vector<16x256xbf16>, vector<256x512xbf16>, vector<16x512xf32> -> vector<16x512xf32>
    %c0_3 = arith.constant 0 : index
    %c0_4 = arith.constant 0 : index
    %3 = vector.load %arg3[%c0_3, %c0_4] : memref<1x512xf32, #tpu.memory_space<vmem>>, vector<1x512xf32>
    %4 = vector.broadcast %3 : vector<1x512xf32> to vector<16x512xf32>
    %5 = arith.addf %2, %4 : vector<16x512xf32>
    %cst_5 = arith.constant 0.000000e+00 : f32
    %6 = vector.broadcast %cst_5 : f32 to vector<16x512xf32>
    %7 = arith.maximumf %5, %6 : vector<16x512xf32>
    %8 = arith.truncf %7 : vector<16x512xf32> to vector<16x512xbf16>
    %c0_6 = arith.constant 0 : index
    %c0_7 = arith.constant 0 : index
    %9 = vector.load %arg4[%c0_6, %c0_7] : memref<512x128xbf16, #tpu.memory_space<vmem>>, vector<512x128xbf16>
    %cst_8 = arith.constant dense<0.000000e+00> : vector<16x128xf32>
    %10 = tpu.matmul %8, %9, %cst_8 {dimension_numbers = #tpu.dot_dimension_numbers<[1], [0], [0], [1], [0, 0, 1, 1], [], []>} : vector<16x512xbf16>, vector<512x128xbf16>, vector<16x128xf32> -> vector<16x128xf32>
    %c0_9 = arith.constant 0 : index
    %c0_10 = arith.constant 0 : index
    %11 = vector.load %arg5[%c0_9, %c0_10] : memref<1x128xf32, #tpu.memory_space<vmem>>, vector<1x128xf32>
    %12 = vector.broadcast %11 : vector<1x128xf32> to vector<16x128xf32>
    %13 = arith.addf %10, %12 : vector<16x128xf32>
    %cst_11 = arith.constant 0.000000e+00 : f32
    %14 = vector.broadcast %cst_11 : f32 to vector<16x128xf32>
    %15 = arith.maximumf %13, %14 : vector<16x128xf32>
    %16 = arith.truncf %15 : vector<16x128xf32> to vector<16x128xbf16>
    %c0_12 = arith.constant 0 : index
    %c0_13 = arith.constant 0 : index
    %17 = vector.load %arg6[%c0_12, %c0_13] : memref<128x128xbf16, #tpu.memory_space<vmem>>, vector<128x128xbf16>
    %cst_14 = arith.constant dense<0.000000e+00> : vector<16x128xf32>
    %18 = tpu.matmul %16, %17, %cst_14 {dimension_numbers = #tpu.dot_dimension_numbers<[1], [0], [0], [1], [0, 0, 1, 1], [], []>} : vector<16x128xbf16>, vector<128x128xbf16>, vector<16x128xf32> -> vector<16x128xf32>
    %c0_15 = arith.constant 0 : index
    %c0_16 = arith.constant 0 : index
    %19 = vector.load %arg7[%c0_15, %c0_16] : memref<1x128xf32, #tpu.memory_space<vmem>>, vector<1x128xf32>
    %20 = vector.broadcast %19 : vector<1x128xf32> to vector<16x128xf32>
    %21 = arith.addf %18, %20 : vector<16x128xf32>
    %c0_17 = arith.constant 0 : index
    %c0_18 = arith.constant 0 : index
    %22 = vector.load %arg8[%c0_17, %c0_18] : memref<16x128xf32, #tpu.memory_space<vmem>>, vector<16x128xf32>
    tpu.vector_store %arg8[%c0_17, %c0_18], %21 {strides = array<i32>} : memref<16x128xf32, #tpu.memory_space<vmem>>, vector<16x128xf32>,
    return
  }
  func.func @transform_0(%arg0: i32) -> (i32, i32) {
    %c0_i32 = arith.constant 0 : i32
    %c0_i32_0 = arith.constant 0 : i32
    return %arg0, %c0_i32 : i32, i32
  }
  func.func @transform_1(%arg0: i32) -> (i32, i32) {
    %c0_i32 = arith.constant 0 : i32
    %c0_i32_0 = arith.constant 0 : i32
    %c0_i32_1 = arith.constant 0 : i32
    return %c0_i32, %c0_i32_0 : i32, i32
  }
  func.func @transform_2(%arg0: i32) -> (i32, i32) {
    %c0_i32 = arith.constant 0 : i32
    %c0_i32_0 = arith.constant 0 : i32
    %c0_i32_1 = arith.constant 0 : i32
    return %c0_i32, %c0_i32_0 : i32, i32
  }
  func.func @transform_3(%arg0: i32) -> (i32, i32) {
    %c0_i32 = arith.constant 0 : i32
    %c0_i32_0 = arith.constant 0 : i32
    %c0_i32_1 = arith.constant 0 : i32
    return %c0_i32, %c0_i32_0 : i32, i32
  }
  func.func @transform_4(%arg0: i32) -> (i32, i32) {
    %c0_i32 = arith.constant 0 : i32
    %c0_i32_0 = arith.constant 0 : i32
    %c0_i32_1 = arith.constant 0 : i32
    return %c0_i32, %c0_i32_0 : i32, i32
  }
  func.func @transform_5(%arg0: i32) -> (i32, i32) {
    %c0_i32 = arith.constant 0 : i32
    %c0_i32_0 = arith.constant 0 : i32
    %c0_i32_1 = arith.constant 0 : i32
    return %c0_i32, %c0_i32_0 : i32, i32
  }
  func.func @transform_6(%arg0: i32) -> (i32, i32) {
    %c0_i32 = arith.constant 0 : i32
    %c0_i32_0 = arith.constant 0 : i32
    %c0_i32_1 = arith.constant 0 : i32
    return %c0_i32, %c0_i32_0 : i32, i32
  }
  func.func @transform_7(%arg0: i32) -> (i32, i32) {
    %c0_i32 = arith.constant 0 : i32
    %c0_i32_0 = arith.constant 0 : i32
    return %arg0, %c0_i32 : i32, i32
  }
}

</mosaic_0001>

<bundles_post_ra>
// kernel: tpu_custom_call.1
= control target key start
LH: loop header
LB: loop body
LE: loop exit
PB: predicated region body
PF: predicated region fallthrough
CT: control target
= control target key end

     0   :  { %12 = vsyncpa [#allocation3], 0  ;;  %s1668_s0 = inlined_call_operand.hbm [shape: bf16[16,256], index: 0, kind: input, shape index: {}]   ;;  %s1669_s1 = inlined_call_operand.hbm [shape: bf16[256,512], index: 1, kind: input, shape index: {}]   ;;  %s1670_s2 = inlined_call_operand.vmem [shape: f32[1,512], index: 2, kind: input, shape index: {}]   ;;  %s1671_s3 = inlined_call_operand.hbm [shape: bf16[512,128], index: 3, kind: input, shape index: {}]   ;;  %s1672_s4 = inlined_call_operand.vmem [shape: f32[1,128], index: 4, kind: input, shape index: {}]   ;;  %s1673_s5 = inlined_call_operand.hbm [shape: bf16[128,128], index: 5, kind: input, shape index: {}]   ;;  %s1674_s6 = inlined_call_operand.vmem [shape: f32[1,128], index: 6, kind: input, shape index: {}]   ;;  %s1675_s7 = inlined_call_operand.hbm [shape: f32[16,128], index: 7, kind: output, shape index: {}]  }
   0x1   :  { %13 = vsyncpa [#allocation6], 0 }
   0x2   :  { %14 = vsyncpa [#allocation9], 0 }
   0x3   :  { %15 = vsyncpa [#allocation4], 0  ;;  %s1531_s24 = smov [#allocation5]   ;;  %s1413_s28 = scalar_lea.hbm %s1669_s1, 8192 }
   0x4   :  { %s33_s25 = sshll.u32 %s1531_s24, 4  ;;  %p1414_p0 = scmp.ne.s32.totalorder %s1669_s1, %s1413_s28  ;;  %s34_s25 = int_to_ptr.vmem [resolvable:$true] %s33_s25 }
   0x5   :  { %p1417_p1 = scmp.lt.u32.totalorder %s1413_s28, %s1669_s1 }
   0x7   :  { %p1419_p2 = pnand %p1417_p1, %p1414_p0 }
   0x9   :  { %1422 = shalt.err (!%p1419_p2)
}
   0xa   :  { %s1423_s10 = scalar_lea.vmem %s34_s25, 8192  ;;  %p1428_p4 = scmp.lt.s32.totalorder %s34_s25, %s34_s25 }
   0xb   :  { %p1424_p3 = scmp.ne.s32.totalorder %s34_s25, %s1423_s10  ;;  %p1429_p5 = scmp.lt.s32.totalorder %s1423_s10, %s1423_s10 }
   0xd   :  { %p1430_p6 = por %p1429_p5, %p1428_p4 }
   0xf   :  { %p1431_p7 = pnand %p1430_p6, %p1424_p3 }
  0x11   :  { %1434 = shalt.err (!%p1431_p7)
}
  0x12   :  { %s1532_s11 = smov 256   ;;  %s1533_s12 = smov 16  }
  0x13   :  { %39 = dma.hbm_to_vmem [thread:$0]  %s1669_s1, 8192, %s34_s25, [#allocation6], %s1532_s11, %s1532_s11, %s1533_s12  }
  0x14   :  { %s1534_s15 = smov [#allocation2]   ;;  %s1435_s19 = scalar_lea.hbm %s1668_s0, 256 }
  0x15   :  { %s21_s16 = sshll.u32 %s1534_s15, 4  ;;  %p1436_p8 = scmp.ne.s32.totalorder %s1668_s0, %s1435_s19  ;;  %s22_s16 = int_to_ptr.vmem [resolvable:$true] %s21_s16 }
  0x16   :  { %p1439_p9 = scmp.lt.u32.totalorder %s1435_s19, %s1668_s0 }
  0x18   :  { %p1441_p10 = pnand %p1439_p9, %p1436_p8 }
  0x1a   :  { %1444 = shalt.err (!%p1441_p10)
}
  0x1b   :  { %s1445_s24 = scalar_lea.vmem %s22_s16, 256  ;;  %p1450_p12 = scmp.lt.s32.totalorder %s22_s16, %s22_s16 }
  0x1c   :  { %p1446_p11 = scmp.ne.s32.totalorder %s22_s16, %s1445_s24  ;;  %p1451_p13 = scmp.lt.s32.totalorder %s1445_s24, %s1445_s24 }
  0x1e   :  { %p1452_p0 = por %p1451_p13, %p1450_p12 }
  0x20   :  { %p1453_p1 = pnand %p1452_p0, %p1446_p11 }
  0x22   :  { %1456 = shalt.err (!%p1453_p1)
}
  0x23   :  { %s1535_s1 = smov 128   ;;  %s1536_s25 = smov 8  }
  0x24   :  { %27 = dma.hbm_to_vmem [thread:$0]  %s1668_s0, 256, %s22_s16, [#allocation3], %s1535_s1, %s1535_s1, %s1536_s25  }
  0x25   :  { %s1537_s28 = smov [#allocation7]   ;;  %s1457_s9 = scalar_lea.hbm %s1671_s3, 4096 }
  0x26   :  { %s47_s29 = sshll.u32 %s1537_s28, 4  ;;  %p1458_p2 = scmp.ne.s32.totalorder %s1671_s3, %s1457_s9  ;;  %s48_s29 = int_to_ptr.vmem [resolvable:$true] %s47_s29 }
  0x27   :  { %p1461_p3 = scmp.lt.u32.totalorder %s1457_s9, %s1671_s3 }
  0x29   :  { %p1463_p4 = pnand %p1461_p3, %p1458_p2 }
  0x2b   :  { %1466 = shalt.err (!%p1463_p4)
}
  0x2c   :  { %s1467_s14 = scalar_lea.vmem %s48_s29, 4096  ;;  %p1472_p6 = scmp.lt.s32.totalorder %s48_s29, %s48_s29 }
  0x2d   :  { %p1468_p5 = scmp.ne.s32.totalorder %s48_s29, %s1467_s14  ;;  %p1473_p7 = scmp.lt.s32.totalorder %s1467_s14, %s1467_s14 }
  0x2f   :  { %p1474_p8 = por %p1473_p7, %p1472_p6 }
  0x31   :  { %p1475_p9 = pnand %p1474_p8, %p1468_p5 }
  0x33   :  { %1478 = shalt.err (!%p1475_p9)
}
  0x34   :  { %s1538_s0 = smov 64   ;;  %s1539_s15 = smov 4  }
  0x35   :  { %53 = dma.hbm_to_vmem [thread:$0]  %s1671_s3, 4096, %s48_s29, [#allocation6], %s1538_s0, %s1538_s0, %s1539_s15  }
  0x36   :  { %s1540_s18 = smov [#allocation8]   ;;  %s1479_s22 = scalar_lea.hbm %s1673_s5, 1024 }
  0x37   :  { %s61_s19 = sshll.u32 %s1540_s18, 4  ;;  %p1480_p10 = scmp.ne.s32.totalorder %s1673_s5, %s1479_s22  ;;  %s62_s19 = int_to_ptr.vmem [resolvable:$true] %s61_s19 }
  0x38   :  { %p1483_p11 = scmp.lt.u32.totalorder %s1479_s22, %s1673_s5 }
  0x3a   :  { %p1485_p12 = pnand %p1483_p11, %p1480_p10 }
  0x3c   :  { %1488 = shalt.err (!%p1485_p12)
}
  0x3d   :  { %s1489_s28 = scalar_lea.vmem %s62_s19, 1024  ;;  %p1494_p0 = scmp.lt.s32.totalorder %s62_s19, %s62_s19 }
  0x3e   :  { %p1490_p13 = scmp.ne.s32.totalorder %s62_s19, %s1489_s28  ;;  %p1495_p1 = scmp.lt.s32.totalorder %s1489_s28, %s1489_s28 }
  0x40   :  { %p1496_p2 = por %p1495_p1, %p1494_p0 }
  0x42   :  { %p1497_p3 = pnand %p1496_p2, %p1490_p13 }
  0x44   :  { %1500 = shalt.err (!%p1497_p3)
}
  0x45   :  { %67 = dma.hbm_to_vmem [thread:$0]  %s1673_s5, 1024, %s62_s19, [#allocation9], %s1538_s0, %s1538_s0, %s1539_s15  }
  0x46   :  { %1523 = dma.done.wait [#allocation3], 256  }
  0x47   :  { %1524 = vsyncadd [#allocation3], 4294967040 }
  0x48   :  { %1525 = dma.done.wait [#allocation6], 12288  }
  0x49   :  { %1526 = vsyncadd [#allocation6], 4294955008 }
  0x4a   :  { %1527 = dma.done.wait [#allocation9], 1024  }
  0x4b   :  { %1528 = vsyncadd [#allocation9], 4294966272  ;;  %v1274_v0 = vld [vmem:[#allocation5 + $0x4] ss:$16 sps:$4 sm:$0xff]   ;;  %v1276_v1 = vld [vmem:[#allocation5 + $0xc] ss:$16 sps:$4 sm:$0xff]  }
  0x4c   :  { %501 = vmatprep.subr.bf16.mxu0 %v1274_v0  ;;  %v1278_v2 = vld [vmem:[#allocation5] ss:$16 sps:$4 sm:$0xff]   ;;  %v1279_v3 = vld [vmem:[#allocation5 + $0x8] ss:$16 sps:$4 sm:$0xff]   ;;  %544 = vmatprep.subr.bf16.mxu1 %v1276_v1  ;;  %v1280_v4 = vld [vmem:[#allocation5 + $0x24] ss:$16 sps:$4 sm:$0xff]  }
  0x4d   :  { %502 = vmatpush1.bf16.msra.mxu0 %v1278_v2  ;;  %545 = vmatpush1.bf16.msra.mxu1 %v1279_v3  ;;  %v1282_v5 = vld [vmem:[#allocation5 + $0x2c] ss:$16 sps:$4 sm:$0xff]   ;;  %v1284_v6 = vld [vmem:[#allocation5 + $0x20] ss:$16 sps:$4 sm:$0xff]   ;;  %v1285_v7 = vld [vmem:[#allocation5 + $0x28] ss:$16 sps:$4 sm:$0xff]  }
  0x4e   :  { %503 = vmatprep.subr.bf16.mxu0 %v1280_v4  ;;  %546 = vmatprep.subr.bf16.mxu1 %v1282_v5  ;;  %v1286_v8 = vld [vmem:[#allocation5 + $0x44] ss:$16 sps:$4 sm:$0xff]   ;;  %v1288_v9 = vld [vmem:[#allocation5 + $0x4c] ss:$16 sps:$4 sm:$0xff]   ;;  %v1290_v10 = vld [vmem:[#allocation5 + $0x40] ss:$16 sps:$4 sm:$0xff]  }
  0x4f   :  { %v1291_v11 = vld [vmem:[#allocation5 + $0x48] ss:$16 sps:$4 sm:$0xff]   ;;  %v1292_v12 = vld [vmem:[#allocation5 + $0x64] ss:$16 sps:$4 sm:$0xff]   ;;  %v1294_v13 = vld [vmem:[#allocation5 + $0x6c] ss:$16 sps:$4 sm:$0xff]  }
  0x50   :  { %v1296_v14 = vld [vmem:[#allocation5 + $0x60] ss:$16 sps:$4 sm:$0xff]   ;;  %v1297_v15 = vld [vmem:[#allocation5 + $0x68] ss:$16 sps:$4 sm:$0xff]   ;;  %v1298_v16 = vld [vmem:[#allocation5 + $0x84] ss:$16 sps:$4 sm:$0xff]  }
  0x51   :  { %504 = vmatpush1.bf16.msra.mxu0 %v1284_v6  ;;  %547 = vmatpush1.bf16.msra.mxu1 %v1285_v7  ;;  %v1300_v17 = vld [vmem:[#allocation5 + $0x8c] ss:$16 sps:$4 sm:$0xff]   ;;  %v1302_v18 = vld [vmem:[#allocation5 + $0x80] ss:$16 sps:$4 sm:$0xff]   ;;  %v1303_v19 = vld [vmem:[#allocation5 + $0x88] ss:$16 sps:$4 sm:$0xff]  }
  0x52   :  { %505 = vmatprep.subr.bf16.mxu0 %v1286_v8  ;;  %548 = vmatprep.subr.bf16.mxu1 %v1288_v9  ;;  %v1304_v20 = vld [vmem:[#allocation5 + $0xa4] ss:$16 sps:$4 sm:$0xff]   ;;  %v1306_v21 = vld [vmem:[#allocation5 + $0xac] ss:$16 sps:$4 sm:$0xff]   ;;  %v1308_v22 = vld [vmem:[#allocation5 + $0xa0] ss:$16 sps:$4 sm:$0xff]  }
  0x53   :  { %v1309_v23 = vld [vmem:[#allocation5 + $0xa8] ss:$16 sps:$4 sm:$0xff]   ;;  %v1310_v24 = vld [vmem:[#allocation5 + $0xc4] ss:$16 sps:$4 sm:$0xff]   ;;  %v1312_v25 = vld [vmem:[#allocation5 + $0xcc] ss:$16 sps:$4 sm:$0xff]  }
  0x54   :  { %v1314_v26 = vld [vmem:[#allocation5 + $0xc0] ss:$16 sps:$4 sm:$0xff]   ;;  %v1315_v27 = vld [vmem:[#allocation5 + $0xc8] ss:$16 sps:$4 sm:$0xff]   ;;  %v1316_v28 = vld [vmem:[#allocation5 + $0xe4] ss:$16 sps:$4 sm:$0xff]  }
  0x55   :  { %506 = vmatpush1.bf16.msra.mxu0 %v1290_v10  ;;  %549 = vmatpush1.bf16.msra.mxu1 %v1291_v11  ;;  %v1318_v29 = vld [vmem:[#allocation5 + $0xec] ss:$16 sps:$4 sm:$0xff]   ;;  %v1320_v30 = vld [vmem:[#allocation5 + $0xe0] ss:$16 sps:$4 sm:$0xff]   ;;  %v1321_v31 = vld [vmem:[#allocation5 + $0xe8] ss:$16 sps:$4 sm:$0xff]  }
  0x56   :  { %507 = vmatprep.subr.bf16.mxu0 %v1292_v12  ;;  %550 = vmatprep.subr.bf16.mxu1 %v1294_v13  ;;  %v1322_v32 = vld [vmem:[#allocation5 + $0x104] ss:$16 sps:$4 sm:$0xff]   ;;  %v1324_v33 = vld [vmem:[#allocation5 + $0x10c] ss:$16 sps:$4 sm:$0xff]   ;;  %v1326_v34 = vld [vmem:[#allocation5 + $0x100] ss:$16 sps:$4 sm:$0xff]  }
  0x57   :  { %v1327_v35 = vld [vmem:[#allocation5 + $0x108] ss:$16 sps:$4 sm:$0xff]   ;;  %v1328_v36 = vld [vmem:[#allocation5 + $0x124] ss:$16 sps:$4 sm:$0xff]   ;;  %v1330_v37 = vld [vmem:[#allocation5 + $0x12c] ss:$16 sps:$4 sm:$0xff]  }
  0x58   :  { %v1332_v38 = vld [vmem:[#allocation5 + $0x120] ss:$16 sps:$4 sm:$0xff]   ;;  %v1333_v39 = vld [vmem:[#allocation5 + $0x128] ss:$16 sps:$4 sm:$0xff]   ;;  %v1334_v40 = vld [vmem:[#allocation5 + $0x144] ss:$16 sps:$4 sm:$0xff]  }
  0x59   :  { %508 = vmatpush1.bf16.msra.mxu0 %v1296_v14  ;;  %551 = vmatpush1.bf16.msra.mxu1 %v1297_v15  ;;  %v1336_v41 = vld [vmem:[#allocation5 + $0x14c] ss:$16 sps:$4 sm:$0xff]   ;;  %v1338_v42 = vld [vmem:[#allocation5 + $0x140] ss:$16 sps:$4 sm:$0xff]   ;;  %v1339_v43 = vld [vmem:[#allocation5 + $0x148] ss:$16 sps:$4 sm:$0xff]  }
  0x5a   :  { %509 = vmatprep.subr.bf16.mxu0 %v1298_v16  ;;  %552 = vmatprep.subr.bf16.mxu1 %v1300_v17  ;;  %v1340_v44 = vld [vmem:[#allocation5 + $0x164] ss:$16 sps:$4 sm:$0xff]   ;;  %v1342_v45 = vld [vmem:[#allocation5 + $0x16c] ss:$16 sps:$4 sm:$0xff]   ;;  %v1344_v46 = vld [vmem:[#allocation5 + $0x160] ss:$16 sps:$4 sm:$0xff]  }
  0x5b   :  { %v1345_v47 = vld [vmem:[#allocation5 + $0x168] ss:$16 sps:$4 sm:$0xff]   ;;  %v1372_v48 = vld [vmem:[#allocation2 + $0x4] ss:$8 sps:$4 sm:$0xff]   ;;  %v1350_v51 = vld [vmem:[#allocation5 + $0x180] ss:$16 sps:$4 sm:$0xff]  }
  0x5c   :  { %v1346_v49 = vld [vmem:[#allocation5 + $0x184] ss:$16 sps:$4 sm:$0xff]   ;;  %v1348_v50 = vld [vmem:[#allocation5 + $0x18c] ss:$16 sps:$4 sm:$0xff]   ;;  %533 = vmatprep.mubr.bf16.mxu0 %v1372_v48  ;;  %576 = vmatprep.mubr.bf16.mxu1 %v1372_v48  ;;  %v1351_v52 = vld [vmem:[#allocation5 + $0x188] ss:$16 sps:$4 sm:$0xff]  }
  0x5d   :  { %510 = vmatpush1.bf16.msra.mxu0 %v1302_v18  ;;  %553 = vmatpush1.bf16.msra.mxu1 %v1303_v19  ;;  %v1352_v53 = vld [vmem:[#allocation5 + $0x1a4] ss:$16 sps:$4 sm:$0xff]   ;;  %v1354_v54 = vld [vmem:[#allocation5 + $0x1ac] ss:$16 sps:$4 sm:$0xff]   ;;  %v1356_v55 = vld [vmem:[#allocation5 + $0x1a0] ss:$16 sps:$4 sm:$0xff]  }
  0x5e   :  { %511 = vmatprep.subr.bf16.mxu0 %v1304_v20  ;;  %554 = vmatprep.subr.bf16.mxu1 %v1306_v21  ;;  %v1357_v56 = vld [vmem:[#allocation5 + $0x1a8] ss:$16 sps:$4 sm:$0xff]   ;;  %v1358_v57 = vld [vmem:[#allocation5 + $0x1c4] ss:$16 sps:$4 sm:$0xff]   ;;  %v1360_v58 = vld [vmem:[#allocation5 + $0x1cc] ss:$16 sps:$4 sm:$0xff]  }
  0x5f   :  { %v1362_v59 = vld [vmem:[#allocation5 + $0x1c0] ss:$16 sps:$4 sm:$0xff]   ;;  %v1363_v60 = vld [vmem:[#allocation5 + $0x1c8] ss:$16 sps:$4 sm:$0xff]   ;;  %v1364_v61 = vld [vmem:[#allocation5 + $0x1e4] ss:$16 sps:$4 sm:$0xff]  }
  0x60   :  { %v1366_v62 = vld [vmem:[#allocation5 + $0x1ec] ss:$16 sps:$4 sm:$0xff]   ;;  %v1368_v63 = vld [vmem:[#allocation5 + $0x1e0] ss:$16 sps:$4 sm:$0xff]   ;;  %v1369_v0 = vld [vmem:[#allocation5 + $0x1e8] ss:$16 sps:$4 sm:$0xff]  }
  0x61   :  { %512 = vmatpush1.bf16.msra.mxu0 %v1308_v22  ;;  %555 = vmatpush1.bf16.msra.mxu1 %v1309_v23  ;;  %v1373_v1 = vld [vmem:[#allocation7 + $0x40] sm:$0xff]   ;;  %v1370_v2 = vld [vmem:[#allocation2] ss:$8 sps:$4 sm:$0xff]   ;;  %v1377_v6 = vld [vmem:[#allocation7 + $0x48] sm:$0xff]   ;;  %vm1542_vm0 = vmmov 0   ;;  %s1543_s10 = smov [#allocation10]  }
  0x62   :  { %513 = vmatprep.subr.bf16.mxu0 %v1310_v24  ;;  %556 = vmatprep.subr.bf16.mxu1 %v1312_v25  ;;  %v1374_v3 = vld [vmem:[#allocation7 + $0xc0] sm:$0xff]   ;;  %v1378_v7 = vld [vmem:[#allocation7 + $0xc8] sm:$0xff]   ;;  %v1381_v10 = vld [vmem:[#allocation7 + $0x50] sm:$0xff]   ;;  %s1066_s11 = sshll.u32 %s1543_s10, 4  ;;  %s1067_s11 = int_to_ptr.vmem [resolvable:$true] %s1066_s11 }
  0x63   :  { %v1375_v4 = vld [vmem:[#allocation7] sm:$0xff]   ;;  %v1379_v8 = vld [vmem:[#allocation7 + $0x8] sm:$0xff]   ;;  %v1382_v11 = vld [vmem:[#allocation7 + $0xd0] sm:$0xff]   ;;  %s1501_s12 = scalar_lea.vmem %s1067_s11, 256  ;;  %p1506_p5 = scmp.lt.s32.totalorder %s1067_s11, %s1067_s11 }
  0x64   :  { %v1376_v5 = vld [vmem:[#allocation7 + $0x80] sm:$0xff]   ;;  %v1380_v9 = vld [vmem:[#allocation7 + $0x88] sm:$0xff]   ;;  %v1383_v12 = vld [vmem:[#allocation7 + $0x10] sm:$0xff]   ;;  %p1502_p4 = scmp.ne.s32.totalorder %s1067_s11, %s1501_s12  ;;  %p1507_p6 = scmp.lt.s32.totalorder %s1501_s12, %s1501_s12 }
  0x65   :  { %514 = vmatpush1.bf16.msra.mxu0 %v1314_v26  ;;  %557 = vmatpush1.bf16.msra.mxu1 %v1315_v27  ;;  %v1384_v13 = vld [vmem:[#allocation7 + $0x90] sm:$0xff]   ;;  %v1385_v14 = vld [vmem:[#allocation7 + $0x58] sm:$0xff]   ;;  %v1389_v18 = vld [vmem:[#allocation7 + $0x60] sm:$0xff]  }
  0x66   :  { %515 = vmatprep.subr.bf16.mxu0 %v1316_v28  ;;  %558 = vmatprep.subr.bf16.mxu1 %v1318_v29  ;;  %v1386_v15 = vld [vmem:[#allocation7 + $0xd8] sm:$0xff]   ;;  %v1390_v19 = vld [vmem:[#allocation7 + $0xe0] sm:$0xff]   ;;  %v1393_v22 = vld [vmem:[#allocation7 + $0x68] sm:$0xff]   ;;  %p1508_p7 = por %p1507_p6, %p1506_p5 }
  0x67   :  { %v1387_v16 = vld [vmem:[#allocation7 + $0x18] sm:$0xff]   ;;  %v1391_v20 = vld [vmem:[#allocation7 + $0x20] sm:$0xff]   ;;  %v1394_v23 = vld [vmem:[#allocation7 + $0xe8] sm:$0xff]  }
  0x68   :  { %v1388_v17 = vld [vmem:[#allocation7 + $0x98] sm:$0xff]   ;;  %v1392_v21 = vld [vmem:[#allocation7 + $0xa0] sm:$0xff]   ;;  %v1395_v24 = vld [vmem:[#allocation7 + $0x28] sm:$0xff]   ;;  %p1509_p8 = pnand %p1508_p7, %p1502_p4 }
  0x69   :  { %516 = vmatpush1.bf16.msra.mxu0 %v1320_v30  ;;  %559 = vmatpush1.bf16.msra.mxu1 %v1321_v31  ;;  %v1396_v25 = vld [vmem:[#allocation7 + $0xa8] sm:$0xff]   ;;  %v1397_v26 = vld [vmem:[#allocation7 + $0x70] sm:$0xff]   ;;  %v1401_v30 = vld [vmem:[#allocation7 + $0x78] sm:$0xff]  }
  0x6a   :  { %517 = vmatprep.subr.bf16.mxu0 %v1322_v32  ;;  %560 = vmatprep.subr.bf16.mxu1 %v1324_v33  ;;  %v1398_v27 = vld [vmem:[#allocation7 + $0xf0] sm:$0xff]   ;;  %v1402_v31 = vld [vmem:[#allocation7 + $0xf8] sm:$0xff]  }
  0x6b   :  { %v1399_v28 = vld [vmem:[#allocation7 + $0x30] sm:$0xff]   ;;  %v1403_v32 = vld [vmem:[#allocation7 + $0x38] sm:$0xff]  }
  0x6c   :  { %v1400_v29 = vld [vmem:[#allocation7 + $0xb0] sm:$0xff]   ;;  %v1404_v33 = vld [vmem:[#allocation7 + $0xb8] sm:$0xff]  }
  0x6d   :  { %518 = vmatpush1.bf16.msra.mxu0 %v1326_v34  ;;  %561 = vmatpush1.bf16.msra.mxu1 %v1327_v35  ;;  %v1541_v34 = vmov 0.0   ;;  %v151_v35 = vlaneseq }
  0x6e   :  { %519 = vmatprep.subr.bf16.mxu0 %v1328_v36  ;;  %562 = vmatprep.subr.bf16.mxu1 %v1330_v37 }
  0x6f   :  { %v152_v36 = vshrl.u32 %v151_v35, 7 }
  0x71   :  { %520 = vmatpush1.bf16.msra.mxu0 %v1332_v38  ;;  %563 = vmatpush1.bf16.msra.mxu1 %v1333_v39  ;;  %v153_v37 = vsub.s32 0, %v152_v36  ;;  %v161_v38 = vsub.s32 2, %v152_v36  ;;  %v149_v39 = vld [vmem:[%s1670_s2] sm:$0xf] }
  0x72   :  { %521 = vmatprep.subr.bf16.mxu0 %v1334_v40  ;;  %564 = vmatprep.subr.bf16.mxu1 %v1336_v41  ;;  %v157_v40 = vsub.s32 1, %v152_v36  ;;  %v165_v41 = vsub.s32 3, %v152_v36 }
  0x75   :  { %522 = vmatpush1.bf16.msra.mxu0 %v1338_v42  ;;  %565 = vmatpush1.bf16.msra.mxu1 %v1339_v43  ;;  %v154_v42 = vrot.slane %v149_v39, %v153_v37  ;;  %v162_v43 = vrot.slane %v149_v39, %v161_v38  ;;  %v1179_v38 = vld [vmem:[%s1674_s6] ss:$0 sm:$0xff] }
  0x76   :  { %523 = vmatprep.subr.bf16.mxu0 %v1340_v44  ;;  %566 = vmatprep.subr.bf16.mxu1 %v1342_v45  ;;  %v158_v44 = vrot.slane %v149_v39, %v157_v40  ;;  %v166_v45 = vrot.slane %v149_v39, %v165_v41 }
  0x79   :  { %524 = vmatpush1.bf16.msra.mxu0 %v1344_v46  ;;  %567 = vmatpush1.bf16.msra.mxu1 %v1345_v47 }
  0x7a   :  { %525 = vmatprep.subr.bf16.mxu0 %v1346_v49  ;;  %568 = vmatprep.subr.bf16.mxu1 %v1348_v50 }
  0x7d   :  { %526 = vmatpush1.bf16.msra.mxu0 %v1350_v51  ;;  %569 = vmatpush1.bf16.msra.mxu1 %v1351_v52 }
  0x7e   :  { %527 = vmatprep.subr.bf16.mxu0 %v1352_v53  ;;  %570 = vmatprep.subr.bf16.mxu1 %v1354_v54 }
  0x81   :  { %528 = vmatpush1.bf16.msra.mxu0 %v1356_v55  ;;  %571 = vmatpush1.bf16.msra.mxu1 %v1357_v56 }
  0x82   :  { %529 = vmatprep.subr.bf16.mxu0 %v1358_v57  ;;  %572 = vmatprep.subr.bf16.mxu1 %v1360_v58 }
  0x85   :  { %530 = vmatpush1.bf16.msra.mxu0 %v1362_v59  ;;  %573 = vmatpush1.bf16.msra.mxu1 %v1363_v60 }
  0x86   :  { %531 = vmatprep.subr.bf16.mxu0 %v1364_v61  ;;  %574 = vmatprep.subr.bf16.mxu1 %v1366_v62 }
  0x89   :  { %532 = vmatpush1.bf16.msra.mxu0 %v1368_v63  ;;  %575 = vmatpush1.bf16.msra.mxu1 %v1369_v0 }
  0x8a   :  { %1188 = vmatprep.subr.bf16.mxu0 %v1373_v1  ;;  %1210 = vmatprep.subr.bf16.mxu1 %v1374_v3 }
  0x8c   :  { %534 = vmatmul.mubr.bf16.vlgmr.msra.gmra.mrb[0].mxu0 %v1370_v2  ;;  %577 = vmatmul.mubr.bf16.vlgmr.msra.gmra.mrb[0].mxu1 %v1370_v2 }
  0x8d   :  { %1189 = vmatpush3.bf16.msra.mxu0 %v1375_v4  ;;  %1211 = vmatpush3.bf16.msra.mxu1 %v1376_v5 }
  0x8e   :  { %1190 = vmatprep.subr.bf16.mxu0 %v1377_v6  ;;  %1212 = vmatprep.subr.bf16.mxu1 %v1378_v7 }
  0x91   :  { %1191 = vmatpush3.bf16.msra.mxu0 %v1379_v8  ;;  %1213 = vmatpush3.bf16.msra.mxu1 %v1380_v9 }
  0x92   :  { %1192 = vmatprep.subr.bf16.mxu0 %v1381_v10  ;;  %1214 = vmatprep.subr.bf16.mxu1 %v1382_v11  ;;  %v1405_v10 = vld [vmem:[#allocation8] sm:$0xff]   ;;  %v1406_v11 = vld [vmem:[#allocation8 + $0x8] sm:$0xff]  }
  0x95   :  { %1193 = vmatpush3.bf16.msra.mxu0 %v1383_v12  ;;  %1215 = vmatpush3.bf16.msra.mxu1 %v1384_v13  ;;  %v1407_v12 = vld [vmem:[#allocation8 + $0x10] sm:$0xff]   ;;  %v1408_v13 = vld [vmem:[#allocation8 + $0x18] sm:$0xff]  }
  0x96   :  { %1194 = vmatprep.subr.bf16.mxu0 %v1385_v14  ;;  %1216 = vmatprep.subr.bf16.mxu1 %v1386_v15  ;;  %v1409_v14 = vld [vmem:[#allocation8 + $0x20] sm:$0xff]   ;;  %v1410_v15 = vld [vmem:[#allocation8 + $0x28] sm:$0xff]  }
  0x99   :  { %1195 = vmatpush3.bf16.msra.mxu0 %v1387_v16  ;;  %1217 = vmatpush3.bf16.msra.mxu1 %v1388_v17  ;;  %v1411_v16 = vld [vmem:[#allocation8 + $0x30] sm:$0xff]   ;;  %v1412_v17 = vld [vmem:[#allocation8 + $0x38] sm:$0xff]  }
  0x9a   :  { %1196 = vmatprep.subr.bf16.mxu0 %v1389_v18  ;;  %1218 = vmatprep.subr.bf16.mxu1 %v1390_v19 }
  0x9d   :  { %1197 = vmatpush3.bf16.msra.mxu0 %v1391_v20  ;;  %1219 = vmatpush3.bf16.msra.mxu1 %v1392_v21  ;;  %v1146_v20 = vld [vmem:[%s1672_s4] ss:$0 sm:$0xff] }
  0x9e   :  { %1198 = vmatprep.subr.bf16.mxu0 %v1393_v22  ;;  %1220 = vmatprep.subr.bf16.mxu1 %v1394_v23 }
  0xa1   :  { %1199 = vmatpush3.bf16.msra.mxu0 %v1395_v24  ;;  %1221 = vmatpush3.bf16.msra.mxu1 %v1396_v25 }
  0xa2   :  { %1200 = vmatprep.subr.bf16.mxu0 %v1397_v26  ;;  %1222 = vmatprep.subr.bf16.mxu1 %v1398_v27 }
  0xa5   :  { %1201 = vmatpush3.bf16.msra.mxu0 %v1399_v28  ;;  %1223 = vmatpush3.bf16.msra.mxu1 %v1400_v29 }
  0xa6   :  { %1202 = vmatprep.subr.bf16.mxu0 %v1401_v30  ;;  %1224 = vmatprep.subr.bf16.mxu1 %v1402_v31 }
  0xa9   :  { %1203 = vmatpush3.bf16.msra.mxu0 %v1403_v32  ;;  %1225 = vmatpush3.bf16.msra.mxu1 %v1404_v33 }
  0xaa   :  { %1241 = vmatprep.subr.bf16.mxu0 %v1541_v34 }
 0x15f   :  { %v535_v46 = vpop.f32.mrb[0].mxu0  ;;  %v578_v47 = vpop.f32.mrb[0].mxu1 }
 0x160   :  { %v536_v48 = vadd.f32 %v535_v46, %v154_v42  ;;  %v579_v49 = vadd.f32 %v578_v47, %v162_v43  ;;  %v537_v50 = vpop.f32.mrb[1].mxu0  ;;  %v580_v51 = vpop.f32.mrb[1].mxu1 }
 0x161   :  { %v538_v52 = vadd.f32 %v537_v50, %v158_v44  ;;  %v581_v53 = vadd.f32 %v580_v51, %v166_v45  ;;  %v539_v54 = vpop.f32.mrb[2].mxu0  ;;  %v582_v55 = vpop.f32.mrb[2].mxu1 }
 0x162   :  { %v589_v56 = vmax.f32 %v579_v49, 0.0  ;;  %v540_v57 = vadd.f32 %v539_v54, %v154_v42  ;;  %v583_v58 = vadd.f32 %v582_v55, %v162_v43  ;;  %v541_v59 = vpop.f32.mrb[3].mxu0  ;;  %v584_v60 = vpop.f32.mrb[3].mxu1  ;;  %v587_v0 = vmax.f32 %v536_v48, 0.0 }
 0x163   :  { %v590_v61 = vmax.f32 %v581_v53, 0.0  ;;  %v542_v62 = vadd.f32 %v541_v59, %v158_v44  ;;  %v585_v63 = vadd.f32 %v584_v60, %v166_v45  ;;  %v588_v3 = vmax.f32 %v538_v52, 0.0 }
 0x164   :  { %v591_v1 = vmax.f32 %v540_v57, 0.0  ;;  %v593_v2 = vmax.f32 %v583_v58, 0.0 }
 0x165   :  { %v592_v4 = vmax.f32 %v542_v62, 0.0  ;;  %v594_v5 = vmax.f32 %v585_v63, 0.0 }
 0x166   :  { %v595_v6 = vpack.c.bf16 %v591_v1, %v587_v0  ;;  %v597_v7 = vpack.c.bf16 %v593_v2, %v589_v56 }
 0x167   :  { %v596_v8 = vpack.c.bf16 %v592_v4, %v588_v3  ;;  %v598_v9 = vpack.c.bf16 %v594_v5, %v590_v61 }
 0x169   :  { %894 = vmatprep.mubr.bf16.mxu0 %v596_v8  ;;  %935 = vmatprep.mubr.bf16.mxu1 %v598_v9 }
 0x16a   :  { %895 = vmatmul.mubr.bf16.vlgmr.msra.gmra.mrb[4].mxu0 %v595_v6  ;;  %936 = vmatmul.mubr.bf16.vlgmr.msra.gmra.mrb[4].mxu1 %v597_v7 }
 0x16b   :  { %1242 = vmatpush3.bf16.msra.mxu0 %v1405_v10  ;;  %1257 = vmatprep.mubr.msk.bf16.mxu0 %vm1542_vm0, %v1541_v34 }
 0x16c   :  { %1243 = vmatprep.subr.bf16.mxu0 %v1541_v34 }
 0x16f   :  { %1244 = vmatpush3.bf16.msra.mxu0 %v1406_v11 }
 0x170   :  { %1245 = vmatprep.subr.bf16.mxu0 %v1541_v34 }
 0x173   :  { %1246 = vmatpush3.bf16.msra.mxu0 %v1407_v12 }
 0x174   :  { %1247 = vmatprep.subr.bf16.mxu0 %v1541_v34 }
 0x177   :  { %1248 = vmatpush3.bf16.msra.mxu0 %v1408_v13 }
 0x178   :  { %1249 = vmatprep.subr.bf16.mxu0 %v1541_v34 }
 0x17b   :  { %1250 = vmatpush3.bf16.msra.mxu0 %v1409_v14 }
 0x17c   :  { %1251 = vmatprep.subr.bf16.mxu0 %v1541_v34 }
 0x17f   :  { %1252 = vmatpush3.bf16.msra.mxu0 %v1410_v15 }
 0x180   :  { %1253 = vmatprep.subr.bf16.mxu0 %v1541_v34 }
 0x183   :  { %1254 = vmatpush3.bf16.msra.mxu0 %v1411_v16 }
 0x184   :  { %1255 = vmatprep.subr.bf16.mxu0 %v1541_v34 }
 0x187   :  { %1256 = vmatpush3.bf16.msra.mxu0 %v1412_v17 }
 0x23d   :  { %v1204_v18 = vpop.f32.mrb[4].mxu0  ;;  %v1226_v19 = vpop.f32.mrb[4].mxu1 }
 0x23e   :  { %v1205_v21 = vpop.f32.mrb[5].mxu0  ;;  %v1227_v22 = vpop.f32.mrb[5].mxu1 }
 0x23f   :  { %v1206_v23 = vadd.f32 %v1205_v21, %v1204_v18  ;;  %v1228_v24 = vadd.f32 %v1227_v22, %v1226_v19  ;;  %v1207_v25 = vpop.f32.mrb[6].mxu0  ;;  %v1229_v26 = vpop.f32.mrb[6].mxu1 }
 0x240   :  { %v1208_v27 = vpop.f32.mrb[7].mxu0  ;;  %v1230_v28 = vpop.f32.mrb[7].mxu1 }
 0x241   :  { %v897_v29 = vadd.f32 %v1206_v23, %v1146_v20  ;;  %v1209_v30 = vadd.f32 %v1208_v27, %v1207_v25  ;;  %v1231_v31 = vadd.f32 %v1230_v28, %v1229_v26 }
 0x243   :  { %v938_v32 = vadd.f32 %v1228_v24, %v897_v29  ;;  %v900_v33 = vadd.f32 %v1209_v30, %v1146_v20 }
 0x245   :  { %v941_v34 = vadd.f32 %v1231_v31, %v900_v33  ;;  %v944_v35 = vmax.f32 %v938_v32, 0.0 }
 0x247   :  { %v945_v36 = vmax.f32 %v941_v34, 0.0 }
 0x249   :  { %v946_v37 = vpack.c.bf16 %v945_v36, %v944_v35 }
 0x24b   :  { %1258 = vmatmul.mubr.bf16.vlgmr.msra.gmra.mrb[8].mxu0 %v946_v37 }
 0x31e   :  { %v1052_v39 = vpop.f32.mrb[8].mxu0 }
 0x31f   :  { %v1053_v40 = vadd.f32 %v1179_v38, %v1052_v39  ;;  %v1259_v41 = vpop.f32.mrb[9].mxu0 }
 0x320   :  { %v1055_v42 = vpop.f32.mrb[10].mxu0 }
 0x321   :  { %1059 = vst [vmem:[#allocation10] sm:$0xff] %v1053_v40  ;;  %v1056_v43 = vadd.f32 %v1179_v38, %v1055_v42  ;;  %v1260_v44 = vpop.f32.mrb[11].mxu0 }
 0x323   :  { %1060 = vst [vmem:[#allocation10 + $0x8] sm:$0xff] %v1056_v43 }
 0x324   :  { %1512 = shalt.err (!%p1509_p8)
}
 0x325   :  { %s1513_s14 = scalar_lea.hbm %s1675_s7, 256 }
 0x326   :  { %p1514_p9 = scmp.ne.s32.totalorder %s1675_s7, %s1513_s14  ;;  %p1517_p10 = scmp.lt.u32.totalorder %s1513_s14, %s1675_s7 }
 0x328   :  { %p1519_p11 = pnand %p1517_p10, %p1514_p9 }
 0x32a   :  { %1522 = shalt.err (!%p1519_p11)
}
 0x32b   :  { %1072 = dma.vmem_to_hbm [thread:$0]  %s1067_s11, 256, %s1675_s7, [#allocation4], %s1535_s1, %s1535_s1, %s1536_s25  }
 0x32c   :  { %1529 = dma.done.wait [#allocation4], 256  }
 0x32d   :  { %1530 = vsyncadd [#allocation4], 4294967040 }
 0x32e   :  { %1076 = vsyncpa [#allocation3], 1 }
 0x32f   :  { %1077 = vsyncpa [#allocation6], 1 }
 0x330   :  { %1078 = vsyncpa [#allocation9], 1 }
 0x331   :  { %1079 = vsyncpa [#allocation4], 1 }

// kernel: tpu_custom_call.1
= control target key start
LH: loop header
LB: loop body
LE: loop exit
PB: predicated region body
PF: predicated region fallthrough
CT: control target
= control target key end

     0   :  { %12 = vsyncpa [#allocation3], 0  ;;  %s1668_s0 = inlined_call_operand.hbm [shape: bf16[16,256], index: 0, kind: input, shape index: {}]   ;;  %s1669_s1 = inlined_call_operand.hbm [shape: bf16[256,512], index: 1, kind: input, shape index: {}]   ;;  %s1670_s2 = inlined_call_operand.vmem [shape: f32[1,512], index: 2, kind: input, shape index: {}]   ;;  %s1671_s3 = inlined_call_operand.hbm [shape: bf16[512,128], index: 3, kind: input, shape index: {}]   ;;  %s1672_s4 = inlined_call_operand.vmem [shape: f32[1,128], index: 4, kind: input, shape index: {}]   ;;  %s1673_s5 = inlined_call_operand.hbm [shape: bf16[128,128], index: 5, kind: input, shape index: {}]   ;;  %s1674_s6 = inlined_call_operand.vmem [shape: f32[1,128], index: 6, kind: input, shape index: {}]   ;;  %s1675_s7 = inlined_call_operand.hbm [shape: f32[16,128], index: 7, kind: output, shape index: {}]  }
   0x1   :  { %13 = vsyncpa [#allocation6], 0 }
   0x2   :  { %14 = vsyncpa [#allocation9], 0 }
   0x3   :  { %15 = vsyncpa [#allocation4], 0  ;;  %s1531_s24 = smov [#allocation5]   ;;  %s1413_s28 = scalar_lea.hbm %s1669_s1, 8192 }
   0x4   :  { %s33_s25 = sshll.u32 %s1531_s24, 4  ;;  %p1414_p0 = scmp.ne.s32.totalorder %s1669_s1, %s1413_s28  ;;  %s34_s25 = int_to_ptr.vmem [resolvable:$true] %s33_s25 }
   0x5   :  { %p1417_p1 = scmp.lt.u32.totalorder %s1413_s28, %s1669_s1 }
   0x7   :  { %p1419_p2 = pnand %p1417_p1, %p1414_p0 }
   0x9   :  { %1422 = shalt.err (!%p1419_p2)
}
   0xa   :  { %s1423_s10 = scalar_lea.vmem %s34_s25, 8192  ;;  %p1428_p4 = scmp.lt.s32.totalorder %s34_s25, %s34_s25 }
   0xb   :  { %p1424_p3 = scmp.ne.s32.totalorder %s34_s25, %s1423_s10  ;;  %p1429_p5 = scmp.lt.s32.totalorder %s1423_s10, %s1423_s10 }
   0xd   :  { %p1430_p6 = por %p1429_p5, %p1428_p4 }
   0xf   :  { %p1431_p7 = pnand %p1430_p6, %p1424_p3 }
  0x11   :  { %1434 = shalt.err (!%p1431_p7)
}
  0x12   :  { %s1532_s11 = smov 256   ;;  %s1533_s12 = smov 16  }
  0x13   :  { %39 = dma.hbm_to_vmem [thread:$0]  %s1669_s1, 8192, %s34_s25, [#allocation6], %s1532_s11, %s1532_s11, %s1533_s12  }
  0x14   :  { %s1534_s15 = smov [#allocation2]   ;;  %s1435_s19 = scalar_lea.hbm %s1668_s0, 256 }
  0x15   :  { %s21_s16 = sshll.u32 %s1534_s15, 4  ;;  %p1436_p8 = scmp.ne.s32.totalorder %s1668_s0, %s1435_s19  ;;  %s22_s16 = int_to_ptr.vmem [resolvable:$true] %s21_s16 }
  0x16   :  { %p1439_p9 = scmp.lt.u32.totalorder %s1435_s19, %s1668_s0 }
  0x18   :  { %p1441_p10 = pnand %p1439_p9, %p1436_p8 }
  0x1a   :  { %1444 = shalt.err (!%p1441_p10)
}
  0x1b   :  { %s1445_s24 = scalar_lea.vmem %s22_s16, 256  ;;  %p1450_p12 = scmp.lt.s32.totalorder %s22_s16, %s22_s16 }
  0x1c   :  { %p1446_p11 = scmp.ne.s32.totalorder %s22_s16, %s1445_s24  ;;  %p1451_p13 = scmp.lt.s32.totalorder %s1445_s24, %s1445_s24 }
  0x1e   :  { %p1452_p0 = por %p1451_p13, %p1450_p12 }
  0x20   :  { %p1453_p1 = pnand %p1452_p0, %p1446_p11 }
  0x22   :  { %1456 = shalt.err (!%p1453_p1)
}
  0x23   :  { %s1535_s1 = smov 128   ;;  %s1536_s25 = smov 8  }
  0x24   :  { %27 = dma.hbm_to_vmem [thread:$0]  %s1668_s0, 256, %s22_s16, [#allocation3], %s1535_s1, %s1535_s1, %s1536_s25  }
  0x25   :  { %s1537_s28 = smov [#allocation7]   ;;  %s1457_s9 = scalar_lea.hbm %s1671_s3, 4096 }
  0x26   :  { %s47_s29 = sshll.u32 %s1537_s28, 4  ;;  %p1458_p2 = scmp.ne.s32.totalorder %s1671_s3, %s1457_s9  ;;  %s48_s29 = int_to_ptr.vmem [resolvable:$true] %s47_s29 }
  0x27   :  { %p1461_p3 = scmp.lt.u32.totalorder %s1457_s9, %s1671_s3 }
  0x29   :  { %p1463_p4 = pnand %p1461_p3, %p1458_p2 }
  0x2b   :  { %1466 = shalt.err (!%p1463_p4)
}
  0x2c   :  { %s1467_s14 = scalar_lea.vmem %s48_s29, 4096  ;;  %p1472_p6 = scmp.lt.s32.totalorder %s48_s29, %s48_s29 }
  0x2d   :  { %p1468_p5 = scmp.ne.s32.totalorder %s48_s29, %s1467_s14  ;;  %p1473_p7 = scmp.lt.s32.totalorder %s1467_s14, %s1467_s14 }
  0x2f   :  { %p1474_p8 = por %p1473_p7, %p1472_p6 }
  0x31   :  { %p1475_p9 = pnand %p1474_p8, %p1468_p5 }
  0x33   :  { %1478 = shalt.err (!%p1475_p9)
}
  0x34   :  { %s1538_s0 = smov 64   ;;  %s1539_s15 = smov 4  }
  0x35   :  { %53 = dma.hbm_to_vmem [thread:$0]  %s1671_s3, 4096, %s48_s29, [#allocation6], %s1538_s0, %s1538_s0, %s1539_s15  }
  0x36   :  { %s1540_s18 = smov [#allocation8]   ;;  %s1479_s22 = scalar_lea.hbm %s1673_s5, 1024 }
  0x37   :  { %s61_s19 = sshll.u32 %s1540_s18, 4  ;;  %p1480_p10 = scmp.ne.s32.totalorder %s1673_s5, %s1479_s22  ;;  %s62_s19 = int_to_ptr.vmem [resolvable:$true] %s61_s19 }
  0x38   :  { %p1483_p11 = scmp.lt.u32.totalorder %s1479_s22, %s1673_s5 }
  0x3a   :  { %p1485_p12 = pnand %p1483_p11, %p1480_p10 }
  0x3c   :  { %1488 = shalt.err (!%p1485_p12)
}
  0x3d   :  { %s1489_s28 = scalar_lea.vmem %s62_s19, 1024  ;;  %p1494_p0 = scmp.lt.s32.totalorder %s62_s19, %s62_s19 }
  0x3e   :  { %p1490_p13 = scmp.ne.s32.totalorder %s62_s19, %s1489_s28  ;;  %p1495_p1 = scmp.lt.s32.totalorder %s1489_s28, %s1489_s28 }
  0x40   :  { %p1496_p2 = por %p1495_p1, %p1494_p0 }
  0x42   :  { %p1497_p3 = pnand %p1496_p2, %p1490_p13 }
  0x44   :  { %1500 = shalt.err (!%p1497_p3)
}
  0x45   :  { %67 = dma.hbm_to_vmem [thread:$0]  %s1673_s5, 1024, %s62_s19, [#allocation9], %s1538_s0, %s1538_s0, %s1539_s15  }
  0x46   :  { %1523 = dma.done.wait [#allocation3], 256  }
  0x47   :  { %1524 = vsyncadd [#allocation3], 4294967040 }
  0x48   :  { %1525 = dma.done.wait [#allocation6], 12288  }
  0x49   :  { %1526 = vsyncadd [#allocation6], 4294955008 }
  0x4a   :  { %1527 = dma.done.wait [#allocation9], 1024  }
  0x4b   :  { %1528 = vsyncadd [#allocation9], 4294966272  ;;  %v1274_v0 = vld [vmem:[#allocation5 + $0x4] ss:$16 sps:$4 sm:$0xff]   ;;  %v1276_v1 = vld [vmem:[#allocation5 + $0xc] ss:$16 sps:$4 sm:$0xff]  }
  0x4c   :  { %501 = vmatprep.subr.bf16.mxu0 %v1274_v0  ;;  %v1278_v2 = vld [vmem:[#allocation5] ss:$16 sps:$4 sm:$0xff]   ;;  %v1279_v3 = vld [vmem:[#allocation5 + $0x8] ss:$16 sps:$4 sm:$0xff]   ;;  %544 = vmatprep.subr.bf16.mxu1 %v1276_v1  ;;  %v1280_v4 = vld [vmem:[#allocation5 + $0x24] ss:$16 sps:$4 sm:$0xff]  }
  0x4d   :  { %502 = vmatpush1.bf16.msra.mxu0 %v1278_v2  ;;  %545 = vmatpush1.bf16.msra.mxu1 %v1279_v3  ;;  %v1282_v5 = vld [vmem:[#allocation5 + $0x2c] ss:$16 sps:$4 sm:$0xff]   ;;  %v1284_v6 = vld [vmem:[#allocation5 + $0x20] ss:$16 sps:$4 sm:$0xff]   ;;  %v1285_v7 = vld [vmem:[#allocation5 + $0x28] ss:$16 sps:$4 sm:$0xff]  }
  0x4e   :  { %503 = vmatprep.subr.bf16.mxu0 %v1280_v4  ;;  %546 = vmatprep.subr.bf16.mxu1 %v1282_v5  ;;  %v1286_v8 = vld [vmem:[#allocation5 + $0x44] ss:$16 sps:$4 sm:$0xff]   ;;  %v1288_v9 = vld [vmem:[#allocation5 + $0x4c] ss:$16 sps:$4 sm:$0xff]   ;;  %v1290_v10 = vld [vmem:[#allocation5 + $0x40] ss:$16 sps:$4 sm:$0xff]  }
  0x4f   :  { %v1291_v11 = vld [vmem:[#allocation5 + $0x48] ss:$16 sps:$4 sm:$0xff]   ;;  %v1292_v12 = vld [vmem:[#allocation5 + $0x64] ss:$16 sps:$4 sm:$0xff]   ;;  %v1294_v13 = vld [vmem:[#allocation5 + $0x6c] ss:$16 sps:$4 sm:$0xff]  }
  0x50   :  { %v1296_v14 = vld [vmem:[#allocation5 + $0x60] ss:$16 sps:$4 sm:$0xff]   ;;  %v1297_v15 = vld [vmem:[#allocation5 + $0x68] ss:$16 sps:$4 sm:$0xff]   ;;  %v1298_v16 = vld [vmem:[#allocation5 + $0x84] ss:$16 sps:$4 sm:$0xff]  }
  0x51   :  { %504 = vmatpush1.bf16.msra.mxu0 %v1284_v6  ;;  %547 = vmatpush1.bf16.msra.mxu1 %v1285_v7  ;;  %v1300_v17 = vld [vmem:[#allocation5 + $0x8c] ss:$16 sps:$4 sm:$0xff]   ;;  %v1302_v18 = vld [vmem:[#allocation5 + $0x80] ss:$16 sps:$4 sm:$0xff]   ;;  %v1303_v19 = vld [vmem:[#allocation5 + $0x88] ss:$16 sps:$4 sm:$0xff]  }
  0x52   :  { %505 = vmatprep.subr.bf16.mxu0 %v1286_v8  ;;  %548 = vmatprep.subr.bf16.mxu1 %v1288_v9  ;;  %v1304_v20 = vld [vmem:[#allocation5 + $0xa4] ss:$16 sps:$4 sm:$0xff]   ;;  %v1306_v21 = vld [vmem:[#allocation5 + $0xac] ss:$16 sps:$4 sm:$0xff]   ;;  %v1308_v22 = vld [vmem:[#allocation5 + $0xa0] ss:$16 sps:$4 sm:$0xff]  }
  0x53   :  { %v1309_v23 = vld [vmem:[#allocation5 + $0xa8] ss:$16 sps:$4 sm:$0xff]   ;;  %v1310_v24 = vld [vmem:[#allocation5 + $0xc4] ss:$16 sps:$4 sm:$0xff]   ;;  %v1312_v25 = vld [vmem:[#allocation5 + $0xcc] ss:$16 sps:$4 sm:$0xff]  }
  0x54   :  { %v1314_v26 = vld [vmem:[#allocation5 + $0xc0] ss:$16 sps:$4 sm:$0xff]   ;;  %v1315_v27 = vld [vmem:[#allocation5 + $0xc8] ss:$16 sps:$4 sm:$0xff]   ;;  %v1316_v28 = vld [vmem:[#allocation5 + $0xe4] ss:$16 sps:$4 sm:$0xff]  }
  0x55   :  { %506 = vmatpush1.bf16.msra.mxu0 %v1290_v10  ;;  %549 = vmatpush1.bf16.msra.mxu1 %v1291_v11  ;;  %v1318_v29 = vld [vmem:[#allocation5 + $0xec] ss:$16 sps:$4 sm:$0xff]   ;;  %v1320_v30 = vld [vmem:[#allocation5 + $0xe0] ss:$16 sps:$4 sm:$0xff]   ;;  %v1321_v31 = vld [vmem:[#allocation5 + $0xe8] ss:$16 sps:$4 sm:$0xff]  }
  0x56   :  { %507 = vmatprep.subr.bf16.mxu0 %v1292_v12  ;;  %550 = vmatprep.subr.bf16.mxu1 %v1294_v13  ;;  %v1322_v32 = vld [vmem:[#allocation5 + $0x104] ss:$16 sps:$4 sm:$0xff]   ;;  %v1324_v33 = vld [vmem:[#allocation5 + $0x10c] ss:$16 sps:$4 sm:$0xff]   ;;  %v1326_v34 = vld [vmem:[#allocation5 + $0x100] ss:$16 sps:$4 sm:$0xff]  }
  0x57   :  { %v1327_v35 = vld [vmem:[#allocation5 + $0x108] ss:$16 sps:$4 sm:$0xff]   ;;  %v1328_v36 = vld [vmem:[#allocation5 + $0x124] ss:$16 sps:$4 sm:$0xff]   ;;  %v1330_v37 = vld [vmem:[#allocation5 + $0x12c] ss:$16 sps:$4 sm:$0xff]  }
  0x58   :  { %v1332_v38 = vld [vmem:[#allocation5 + $0x120] ss:$16 sps:$4 sm:$0xff]   ;;  %v1333_v39 = vld [vmem:[#allocation5 + $0x128] ss:$16 sps:$4 sm:$0xff]   ;;  %v1334_v40 = vld [vmem:[#allocation5 + $0x144] ss:$16 sps:$4 sm:$0xff]  }
  0x59   :  { %508 = vmatpush1.bf16.msra.mxu0 %v1296_v14  ;;  %551 = vmatpush1.bf16.msra.mxu1 %v1297_v15  ;;  %v1336_v41 = vld [vmem:[#allocation5 + $0x14c] ss:$16 sps:$4 sm:$0xff]   ;;  %v1338_v42 = vld [vmem:[#allocation5 + $0x140] ss:$16 sps:$4 sm:$0xff]   ;;  %v1339_v43 = vld [vmem:[#allocation5 + $0x148] ss:$16 sps:$4 sm:$0xff]  }
  0x5a   :  { %509 = vmatprep.subr.bf16.mxu0 %v1298_v16  ;;  %552 = vmatprep.subr.bf16.mxu1 %v1300_v17  ;;  %v1340_v44 = vld [vmem:[#allocation5 + $0x164] ss:$16 sps:$4 sm:$0xff]   ;;  %v1342_v45 = vld [vmem:[#allocation5 + $0x16c] ss:$16 sps:$4 sm:$0xff]   ;;  %v1344_v46 = vld [vmem:[#allocation5 + $0x160] ss:$16 sps:$4 sm:$0xff]  }
  0x5b   :  { %v1345_v47 = vld [vmem:[#allocation5 + $0x168] ss:$16 sps:$4 sm:$0xff]   ;;  %v1372_v48 = vld [vmem:[#allocation2 + $0x4] ss:$8 sps:$4 sm:$0xff]   ;;  %v1350_v51 = vld [vmem:[#allocation5 + $0x180] ss:$16 sps:$4 sm:$0xff]  }
  0x5c   :  { %v1346_v49 = vld [vmem:[#allocation5 + $0x184] ss:$16 sps:$4 sm:$0xff]   ;;  %v1348_v50 = vld [vmem:[#allocation5 + $0x18c] ss:$16 sps:$4 sm:$0xff]   ;;  %533 = vmatprep.mubr.bf16.mxu0 %v1372_v48  ;;  %576 = vmatprep.mubr.bf16.mxu1 %v1372_v48  ;;  %v1351_v52 = vld [vmem:[#allocation5 + $0x188] ss:$16 sps:$4 sm:$0xff]  }
  0x5d   :  { %510 = vmatpush1.bf16.msra.mxu0 %v1302_v18  ;;  %553 = vmatpush1.bf16.msra.mxu1 %v1303_v19  ;;  %v1352_v53 = vld [vmem:[#allocation5 + $0x1a4] ss:$16 sps:$4 sm:$0xff]   ;;  %v1354_v54 = vld [vmem:[#allocation5 + $0x1ac] ss:$16 sps:$4 sm:$0xff]   ;;  %v1356_v55 = vld [vmem:[#allocation5 + $0x1a0] ss:$16 sps:$4 sm:$0xff]  }
  0x5e   :  { %511 = vmatprep.subr.bf16.mxu0 %v1304_v20  ;;  %554 = vmatprep.subr.bf16.mxu1 %v1306_v21  ;;  %v1357_v56 = vld [vmem:[#allocation5 + $0x1a8] ss:$16 sps:$4 sm:$0xff]   ;;  %v1358_v57 = vld [vmem:[#allocation5 + $0x1c4] ss:$16 sps:$4 sm:$0xff]   ;;  %v1360_v58 = vld [vmem:[#allocation5 + $0x1cc] ss:$16 sps:$4 sm:$0xff]  }
  0x5f   :  { %v1362_v59 = vld [vmem:[#allocation5 + $0x1c0] ss:$16 sps:$4 sm:$0xff]   ;;  %v1363_v60 = vld [vmem:[#allocation5 + $0x1c8] ss:$16 sps:$4 sm:$0xff]   ;;  %v1364_v61 = vld [vmem:[#allocation5 + $0x1e4] ss:$16 sps:$4 sm:$0xff]  }
  0x60   :  { %v1366_v62 = vld [vmem:[#allocation5 + $0x1ec] ss:$16 sps:$4 sm:$0xff]   ;;  %v1368_v63 = vld [vmem:[#allocation5 + $0x1e0] ss:$16 sps:$4 sm:$0xff]   ;;  %v1369_v0 = vld [vmem:[#allocation5 + $0x1e8] ss:$16 sps:$4 sm:$0xff]  }
  0x61   :  { %512 = vmatpush1.bf16.msra.mxu0 %v1308_v22  ;;  %555 = vmatpush1.bf16.msra.mxu1 %v1309_v23  ;;  %v1373_v1 = vld [vmem:[#allocation7 + $0x40] sm:$0xff]   ;;  %v1370_v2 = vld [vmem:[#allocation2] ss:$8 sps:$4 sm:$0xff]   ;;  %v1377_v6 = vld [vmem:[#allocation7 + $0x48] sm:$0xff]   ;;  %vm1542_vm0 = vmmov 0   ;;  %s1543_s10 = smov [#allocation10]  }
  0x62   :  { %513 = vmatprep.subr.bf16.mxu0 %v1310_v24  ;;  %556 = vmatprep.subr.bf16.mxu1 %v1312_v25  ;;  %v1374_v3 = vld [vmem:[#allocation7 + $0xc0] sm:$0xff]   ;;  %v1378_v7 = vld [vmem:[#allocation7 + $0xc8] sm:$0xff]   ;;  %v1381_v10 = vld [vmem:[#allocation7 + $0x50] sm:$0xff]   ;;  %s1066_s11 = sshll.u32 %s1543_s10, 4  ;;  %s1067_s11 = int_to_ptr.vmem [resolvable:$true] %s1066_s11 }
  0x63   :  { %v1375_v4 = vld [vmem:[#allocation7] sm:$0xff]   ;;  %v1379_v8 = vld [vmem:[#allocation7 + $0x8] sm:$0xff]   ;;  %v1382_v11 = vld [vmem:[#allocation7 + $0xd0] sm:$0xff]   ;;  %s1501_s12 = scalar_lea.vmem %s1067_s11, 256  ;;  %p1506_p5 = scmp.lt.s32.totalorder %s1067_s11, %s1067_s11 }
  0x64   :  { %v1376_v5 = vld [vmem:[#allocation7 + $0x80] sm:$0xff]   ;;  %v1380_v9 = vld [vmem:[#allocation7 + $0x88] sm:$0xff]   ;;  %v1383_v12 = vld [vmem:[#allocation7 + $0x10] sm:$0xff]   ;;  %p1502_p4 = scmp.ne.s32.totalorder %s1067_s11, %s1501_s12  ;;  %p1507_p6 = scmp.lt.s32.totalorder %s1501_s12, %s1501_s12 }
  0x65   :  { %514 = vmatpush1.bf16.msra.mxu0 %v1314_v26  ;;  %557 = vmatpush1.bf16.msra.mxu1 %v1315_v27  ;;  %v1384_v13 = vld [vmem:[#allocation7 + $0x90] sm:$0xff]   ;;  %v1385_v14 = vld [vmem:[#allocation7 + $0x58] sm:$0xff]   ;;  %v1389_v18 = vld [vmem:[#allocation7 + $0x60] sm:$0xff]  }
  0x66   :  { %515 = vmatprep.subr.bf16.mxu0 %v1316_v28  ;;  %558 = vmatprep.subr.bf16.mxu1 %v1318_v29  ;;  %v1386_v15 = vld [vmem:[#allocation7 + $0xd8] sm:$0xff]   ;;  %v1390_v19 = vld [vmem:[#allocation7 + $0xe0] sm:$0xff]   ;;  %v1393_v22 = vld [vmem:[#allocation7 + $0x68] sm:$0xff]   ;;  %p1508_p7 = por %p1507_p6, %p1506_p5 }
  0x67   :  { %v1387_v16 = vld [vmem:[#allocation7 + $0x18] sm:$0xff]   ;;  %v1391_v20 = vld [vmem:[#allocation7 + $0x20] sm:$0xff]   ;;  %v1394_v23 = vld [vmem:[#allocation7 + $0xe8] sm:$0xff]  }
  0x68   :  { %v1388_v17 = vld [vmem:[#allocation7 + $0x98] sm:$0xff]   ;;  %v1392_v21 = vld [vmem:[#allocation7 + $0xa0] sm:$0xff]   ;;  %v1395_v24 = vld [vmem:[#allocation7 + $0x28] sm:$0xff]   ;;  %p1509_p8 = pnand %p1508_p7, %p1502_p4 }
  0x69   :  { %516 = vmatpush1.bf16.msra.mxu0 %v1320_v30  ;;  %559 = vmatpush1.bf16.msra.mxu1 %v1321_v31  ;;  %v1396_v25 = vld [vmem:[#allocation7 + $0xa8] sm:$0xff]   ;;  %v1397_v26 = vld [vmem:[#allocation7 + $0x70] sm:$0xff]   ;;  %v1401_v30 = vld [vmem:[#allocation7 + $0x78] sm:$0xff]  }
  0x6a   :  { %517 = vmatprep.subr.bf16.mxu0 %v1322_v32  ;;  %560 = vmatprep.subr.bf16.mxu1 %v1324_v33  ;;  %v1398_v27 = vld [vmem:[#allocation7 + $0xf0] sm:$0xff]   ;;  %v1402_v31 = vld [vmem:[#allocation7 + $0xf8] sm:$0xff]  }
  0x6b   :  { %v1399_v28 = vld [vmem:[#allocation7 + $0x30] sm:$0xff]   ;;  %v1403_v32 = vld [vmem:[#allocation7 + $0x38] sm:$0xff]  }
  0x6c   :  { %v1400_v29 = vld [vmem:[#allocation7 + $0xb0] sm:$0xff]   ;;  %v1404_v33 = vld [vmem:[#allocation7 + $0xb8] sm:$0xff]  }
  0x6d   :  { %518 = vmatpush1.bf16.msra.mxu0 %v1326_v34  ;;  %561 = vmatpush1.bf16.msra.mxu1 %v1327_v35  ;;  %v1541_v34 = vmov 0.0   ;;  %v151_v35 = vlaneseq }
  0x6e   :  { %519 = vmatprep.subr.bf16.mxu0 %v1328_v36  ;;  %562 = vmatprep.subr.bf16.mxu1 %v1330_v37 }
  0x6f   :  { %v152_v36 = vshrl.u32 %v151_v35, 7 }
  0x71   :  { %520 = vmatpush1.bf16.msra.mxu0 %v1332_v38  ;;  %563 = vmatpush1.bf16.msra.mxu1 %v1333_v39  ;;  %v153_v37 = vsub.s32 0, %v152_v36  ;;  %v161_v38 = vsub.s32 2, %v152_v36  ;;  %v149_v39 = vld [vmem:[%s1670_s2] sm:$0xf] }
  0x72   :  { %521 = vmatprep.subr.bf16.mxu0 %v1334_v40  ;;  %564 = vmatprep.subr.bf16.mxu1 %v1336_v41  ;;  %v157_v40 = vsub.s32 1, %v152_v36  ;;  %v165_v41 = vsub.s32 3, %v152_v36 }
  0x75   :  { %522 = vmatpush1.bf16.msra.mxu0 %v1338_v42  ;;  %565 = vmatpush1.bf16.msra.mxu1 %v1339_v43  ;;  %v154_v42 = vrot.slane %v149_v39, %v153_v37  ;;  %v162_v43 = vrot.slane %v149_v39, %v161_v38  ;;  %v1179_v38 = vld [vmem:[%s1674_s6] ss:$0 sm:$0xff] }
  0x76   :  { %523 = vmatprep.subr.bf16.mxu0 %v1340_v44  ;;  %566 = vmatprep.subr.bf16.mxu1 %v1342_v45  ;;  %v158_v44 = vrot.slane %v149_v39, %v157_v40  ;;  %v166_v45 = vrot.slane %v149_v39, %v165_v41 }
  0x79   :  { %524 = vmatpush1.bf16.msra.mxu0 %v1344_v46  ;;  %567 = vmatpush1.bf16.msra.mxu1 %v1345_v47 }
  0x7a   :  { %525 = vmatprep.subr.bf16.mxu0 %v1346_v49  ;;  %568 = vmatprep.subr.bf16.mxu1 %v1348_v50 }
  0x7d   :  { %526 = vmatpush1.bf16.msra.mxu0 %v1350_v51  ;;  %569 = vmatpush1.bf16.msra.mxu1 %v1351_v52 }
  0x7e   :  { %527 = vmatprep.subr.bf16.mxu0 %v1352_v53  ;;  %570 = vmatprep.subr.bf16.mxu1 %v1354_v54 }
  0x81   :  { %528 = vmatpush1.bf16.msra.mxu0 %v1356_v55  ;;  %571 = vmatpush1.bf16.msra.mxu1 %v1357_v56 }
  0x82   :  { %529 = vmatprep.subr.bf16.mxu0 %v1358_v57  ;;  %572 = vmatprep.subr.bf16.mxu1 %v1360_v58 }
  0x85   :  { %530 = vmatpush1.bf16.msra.mxu0 %v1362_v59  ;;  %573 = vmatpush1.bf16.msra.mxu1 %v1363_v60 }
  0x86   :  { %531 = vmatprep.subr.bf16.mxu0 %v1364_v61  ;;  %574 = vmatprep.subr.bf16.mxu1 %v1366_v62 }
  0x89   :  { %532 = vmatpush1.bf16.msra.mxu0 %v1368_v63  ;;  %575 = vmatpush1.bf16.msra.mxu1 %v1369_v0 }
  0x8a   :  { %1188 = vmatprep.subr.bf16.mxu0 %v1373_v1  ;;  %1210 = vmatprep.subr.bf16.mxu1 %v1374_v3 }
  0x8c   :  { %534 = vmatmul.mubr.bf16.vlgmr.msra.gmra.mrb[0].mxu0 %v1370_v2  ;;  %577 = vmatmul.mubr.bf16.vlgmr.msra.gmra.mrb[0].mxu1 %v1370_v2 }
  0x8d   :  { %1189 = vmatpush3.bf16.msra.mxu0 %v1375_v4  ;;  %1211 = vmatpush3.bf16.msra.mxu1 %v1376_v5 }
  0x8e   :  { %1190 = vmatprep.subr.bf16.mxu0 %v1377_v6  ;;  %1212 = vmatprep.subr.bf16.mxu1 %v1378_v7 }
  0x91   :  { %1191 = vmatpush3.bf16.msra.mxu0 %v1379_v8  ;;  %1213 = vmatpush3.bf16.msra.mxu1 %v1380_v9 }
  0x92   :  { %1192 = vmatprep.subr.bf16.mxu0 %v1381_v10  ;;  %1214 = vmatprep.subr.bf16.mxu1 %v1382_v11  ;;  %v1405_v10 = vld [vmem:[#allocation8] sm:$0xff]   ;;  %v1406_v11 = vld [vmem:[#allocation8 + $0x8] sm:$0xff]  }
  0x95   :  { %1193 = vmatpush3.bf16.msra.mxu0 %v1383_v12  ;;  %1215 = vmatpush3.bf16.msra.mxu1 %v1384_v13  ;;  %v1407_v12 = vld [vmem:[#allocation8 + $0x10] sm:$0xff]   ;;  %v1408_v13 = vld [vmem:[#allocation8 + $0x18] sm:$0xff]  }
  0x96   :  { %1194 = vmatprep.subr.bf16.mxu0 %v1385_v14  ;;  %1216 = vmatprep.subr.bf16.mxu1 %v1386_v15  ;;  %v1409_v14 = vld [vmem:[#allocation8 + $0x20] sm:$0xff]   ;;  %v1410_v15 = vld [vmem:[#allocation8 + $0x28] sm:$0xff]  }
  0x99   :  { %1195 = vmatpush3.bf16.msra.mxu0 %v1387_v16  ;;  %1217 = vmatpush3.bf16.msra.mxu1 %v1388_v17  ;;  %v1411_v16 = vld [vmem:[#allocation8 + $0x30] sm:$0xff]   ;;  %v1412_v17 = vld [vmem:[#allocation8 + $0x38] sm:$0xff]  }
  0x9a   :  { %1196 = vmatprep.subr.bf16.mxu0 %v1389_v18  ;;  %1218 = vmatprep.subr.bf16.mxu1 %v1390_v19 }
  0x9d   :  { %1197 = vmatpush3.bf16.msra.mxu0 %v1391_v20  ;;  %1219 = vmatpush3.bf16.msra.mxu1 %v1392_v21  ;;  %v1146_v20 = vld [vmem:[%s1672_s4] ss:$0 sm:$0xff] }
  0x9e   :  { %1198 = vmatprep.subr.bf16.mxu0 %v1393_v22  ;;  %1220 = vmatprep.subr.bf16.mxu1 %v1394_v23 }
  0xa1   :  { %1199 = vmatpush3.bf16.msra.mxu0 %v1395_v24  ;;  %1221 = vmatpush3.bf16.msra.mxu1 %v1396_v25 }
  0xa2   :  { %1200 = vmatprep.subr.bf16.mxu0 %v1397_v26  ;;  %1222 = vmatprep.subr.bf16.mxu1 %v1398_v27 }
  0xa5   :  { %1201 = vmatpush3.bf16.msra.mxu0 %v1399_v28  ;;  %1223 = vmatpush3.bf16.msra.mxu1 %v1400_v29 }
  0xa6   :  { %1202 = vmatprep.subr.bf16.mxu0 %v1401_v30  ;;  %1224 = vmatprep.subr.bf16.mxu1 %v1402_v31 }
  0xa9   :  { %1203 = vmatpush3.bf16.msra.mxu0 %v1403_v32  ;;  %1225 = vmatpush3.bf16.msra.mxu1 %v1404_v33 }
  0xaa   :  { %1241 = vmatprep.subr.bf16.mxu0 %v1541_v34 }
 0x15f   :  { %v535_v46 = vpop.f32.mrb[0].mxu0  ;;  %v578_v47 = vpop.f32.mrb[0].mxu1 }
 0x160   :  { %v536_v48 = vadd.f32 %v535_v46, %v154_v42  ;;  %v579_v49 = vadd.f32 %v578_v47, %v162_v43  ;;  %v537_v50 = vpop.f32.mrb[1].mxu0  ;;  %v580_v51 = vpop.f32.mrb[1].mxu1 }
 0x161   :  { %v538_v52 = vadd.f32 %v537_v50, %v158_v44  ;;  %v581_v53 = vadd.f32 %v580_v51, %v166_v45  ;;  %v539_v54 = vpop.f32.mrb[2].mxu0  ;;  %v582_v55 = vpop.f32.mrb[2].mxu1 }
 0x162   :  { %v589_v56 = vmax.f32 %v579_v49, 0.0  ;;  %v540_v57 = vadd.f32 %v539_v54, %v154_v42  ;;  %v583_v58 = vadd.f32 %v582_v55, %v162_v43  ;;  %v541_v59 = vpop.f32.mrb[3].mxu0  ;;  %v584_v60 = vpop.f32.mrb[3].mxu1  ;;  %v587_v0 = vmax.f32 %v536_v48, 0.0 }
 0x163   :  { %v590_v61 = vmax.f32 %v581_v53, 0.0  ;;  %v542_v62 = vadd.f32 %v541_v59, %v158_v44  ;;  %v585_v63 = vadd.f32 %v584_v60, %v166_v45  ;;  %v588_v3 = vmax.f32 %v538_v52, 0.0 }
 0x164   :  { %v591_v1 = vmax.f32 %v540_v57, 0.0  ;;  %v593_v2 = vmax.f32 %v583_v58, 0.0 }
 0x165   :  { %v592_v4 = vmax.f32 %v542_v62, 0.0  ;;  %v594_v5 = vmax.f32 %v585_v63, 0.0 }
 0x166   :  { %v595_v6 = vpack.c.bf16 %v591_v1, %v587_v0  ;;  %v597_v7 = vpack.c.bf16 %v593_v2, %v589_v56 }
 0x167   :  { %v596_v8 = vpack.c.bf16 %v592_v4, %v588_v3  ;;  %v598_v9 = vpack.c.bf16 %v594_v5, %v590_v61 }
 0x169   :  { %894 = vmatprep.mubr.bf16.mxu0 %v596_v8  ;;  %935 = vmatprep.mubr.bf16.mxu1 %v598_v9 }
 0x16a   :  { %895 = vmatmul.mubr.bf16.vlgmr.msra.gmra.mrb[4].mxu0 %v595_v6  ;;  %936 = vmatmul.mubr.bf16.vlgmr.msra.gmra.mrb[4].mxu1 %v597_v7 }
 0x16b   :  { %1242 = vmatpush3.bf16.msra.mxu0 %v1405_v10  ;;  %1257 = vmatprep.mubr.msk.bf16.mxu0 %vm1542_vm0, %v1541_v34 }
 0x16c   :  { %1243 = vmatprep.subr.bf16.mxu0 %v1541_v34 }
 0x16f   :  { %1244 = vmatpush3.bf16.msra.mxu0 %v1406_v11 }
 0x170   :  { %1245 = vmatprep.subr.bf16.mxu0 %v1541_v34 }
 0x173   :  { %1246 = vmatpush3.bf16.msra.mxu0 %v1407_v12 }
 0x174   :  { %1247 = vmatprep.subr.bf16.mxu0 %v1541_v34 }
 0x177   :  { %1248 = vmatpush3.bf16.msra.mxu0 %v1408_v13 }
 0x178   :  { %1249 = vmatprep.subr.bf16.mxu0 %v1541_v34 }
 0x17b   :  { %1250 = vmatpush3.bf16.msra.mxu0 %v1409_v14 }
 0x17c   :  { %1251 = vmatprep.subr.bf16.mxu0 %v1541_v34 }
 0x17f   :  { %1252 = vmatpush3.bf16.msra.mxu0 %v1410_v15 }
 0x180   :  { %1253 = vmatprep.subr.bf16.mxu0 %v1541_v34 }
 0x183   :  { %1254 = vmatpush3.bf16.msra.mxu0 %v1411_v16 }
 0x184   :  { %1255 = vmatprep.subr.bf16.mxu0 %v1541_v34 }
 0x187   :  { %1256 = vmatpush3.bf16.msra.mxu0 %v1412_v17 }
 0x23d   :  { %v1204_v18 = vpop.f32.mrb[4].mxu0  ;;  %v1226_v19 = vpop.f32.mrb[4].mxu1 }
 0x23e   :  { %v1205_v21 = vpop.f32.mrb[5].mxu0  ;;  %v1227_v22 = vpop.f32.mrb[5].mxu1 }
 0x23f   :  { %v1206_v23 = vadd.f32 %v1205_v21, %v1204_v18  ;;  %v1228_v24 = vadd.f32 %v1227_v22, %v1226_v19  ;;  %v1207_v25 = vpop.f32.mrb[6].mxu0  ;;  %v1229_v26 = vpop.f32.mrb[6].mxu1 }
 0x240   :  { %v1208_v27 = vpop.f32.mrb[7].mxu0  ;;  %v1230_v28 = vpop.f32.mrb[7].mxu1 }
 0x241   :  { %v897_v29 = vadd.f32 %v1206_v23, %v1146_v20  ;;  %v1209_v30 = vadd.f32 %v1208_v27, %v1207_v25  ;;  %v1231_v31 = vadd.f32 %v1230_v28, %v1229_v26 }
 0x243   :  { %v938_v32 = vadd.f32 %v1228_v24, %v897_v29  ;;  %v900_v33 = vadd.f32 %v1209_v30, %v1146_v20 }
 0x245   :  { %v941_v34 = vadd.f32 %v1231_v31, %v900_v33  ;;  %v944_v35 = vmax.f32 %v938_v32, 0.0 }
 0x247   :  { %v945_v36 = vmax.f32 %v941_v34, 0.0 }
 0x249   :  { %v946_v37 = vpack.c.bf16 %v945_v36, %v944_v35 }
 0x24b   :  { %1258 = vmatmul.mubr.bf16.vlgmr.msra.gmra.mrb[8].mxu0 %v946_v37 }
 0x31e   :  { %v1052_v39 = vpop.f32.mrb[8].mxu0 }
 0x31f   :  { %v1053_v40 = vadd.f32 %v1179_v38, %v1052_v39  ;;  %v1259_v41 = vpop.f32.mrb[9].mxu0 }
 0x320   :  { %v1055_v42 = vpop.f32.mrb[10].mxu0 }
 0x321   :  { %1059 = vst [vmem:[#allocation10] sm:$0xff] %v1053_v40  ;;  %v1056_v43 = vadd.f32 %v1179_v38, %v1055_v42  ;;  %v1260_v44 = vpop.f32.mrb[11].mxu0 }
 0x323   :  { %1060 = vst [vmem:[#allocation10 + $0x8] sm:$0xff] %v1056_v43 }
 0x324   :  { %1512 = shalt.err (!%p1509_p8)
}
 0x325   :  { %s1513_s14 = scalar_lea.hbm %s1675_s7, 256 }
 0x326   :  { %p1514_p9 = scmp.ne.s32.totalorder %s1675_s7, %s1513_s14  ;;  %p1517_p10 = scmp.lt.u32.totalorder %s1513_s14, %s1675_s7 }
 0x328   :  { %p1519_p11 = pnand %p1517_p10, %p1514_p9 }
 0x32a   :  { %1522 = shalt.err (!%p1519_p11)
}
 0x32b   :  { %1072 = dma.vmem_to_hbm [thread:$0]  %s1067_s11, 256, %s1675_s7, [#allocation4], %s1535_s1, %s1535_s1, %s1536_s25  }
 0x32c   :  { %1529 = dma.done.wait [#allocation4], 256  }
 0x32d   :  { %1530 = vsyncadd [#allocation4], 4294967040 }
 0x32e   :  { %1076 = vsyncpa [#allocation3], 1 }
 0x32f   :  { %1077 = vsyncpa [#allocation6], 1 }
 0x330   :  { %1078 = vsyncpa [#allocation9], 1 }
 0x331   :  { %1079 = vsyncpa [#allocation4], 1 }

</bundles_post_ra>
